<compile_context>
chip_gen: v7x
topology: tpu7x:2x2x1
jax: 0.10.0
libtpu: 0.0.40
codegen_flags: <defaults>
</compile_context>

<pallas_src>
import functools
import math

import jax
import jax.numpy as jnp
from jax.experimental import pallas as pl
from jax.experimental.pallas import tpu as pltpu


def hr_bert_kernel(num_heads,
                   x_ref, bias_ref, emb_g_ref, emb_b_ref,
                   wqkv_ref, bqkv_ref, wo_ref, bo_ref, ln1g_ref, ln1b_ref,
                   wi_ref, bi_ref, wf_ref, bf_ref, ln2g_ref, ln2b_ref,
                   wp_ref, bp_ref, wc_ref, bc_ref,
                   out_ref,
                   x_scratch, ctx_scratch):
    """One grid step == one encoder layer; activations are VMEM-resident."""
    l = pl.program_id(0)
    n_layers = pl.num_programs(0)
    B, T, H = x_ref.shape
    nh = num_heads
    dh = H // nh
    BT = B * T
    scale = 1.0 / math.sqrt(dh)

    def layer_norm(x, g, b):
        mu = jnp.mean(x, axis=-1, keepdims=True)
        xc = x - mu
        var = jnp.mean(xc * xc, axis=-1, keepdims=True)
        return xc * jax.lax.rsqrt(var + 1e-12) * g + b

    # ---- step 0: embedding LayerNorm into the resident activation scratch ----
    @pl.when(l == 0)
    def _():
        x_scratch[...] = layer_norm(x_ref[...].reshape(BT, H),
                                    emb_g_ref[...], emb_b_ref[...])

    x = x_scratch[...]                                         # (BT, H) f32

    # ---- fused QKV projection: single MXU pass, N = 3H, bf16 in / f32 acc ----
    qkv = jnp.dot(x.astype(jnp.bfloat16), wqkv_ref[...],
                  preferred_element_type=jnp.float32) + bqkv_ref[...]
    q3 = qkv[:, 0 * H:1 * H].reshape(B, T, H).astype(jnp.bfloat16)
    k3 = qkv[:, 1 * H:2 * H].reshape(B, T, H).astype(jnp.bfloat16)
    v3 = qkv[:, 2 * H:3 * H].reshape(B, T, H).astype(jnp.bfloat16)

    att_bias = bias_ref[...].reshape(B, 1, T)                  # mask padded keys

    # ---- per-head attention (static unroll); each head's ctx lands at its
    #      static lane offset in a VMEM scratch so the output projection is a
    #      single full-contraction (K=H) matmul -------------------------------
    for h in range(nh):
        lo, hi = h * dh, (h + 1) * dh
        s = jnp.einsum('bqd,bkd->bqk', q3[:, :, lo:hi], k3[:, :, lo:hi],
                       preferred_element_type=jnp.float32) * scale
        s = s + att_bias
        s = s - jnp.max(s, axis=-1, keepdims=True)
        e = jnp.exp(s)                                         # f32 softmax
        p = e * pl.reciprocal(jnp.sum(e, axis=-1, keepdims=True), approx=True)
        ctx = jnp.einsum('bqk,bkd->bqd', p.astype(jnp.bfloat16),
                         v3[:, :, lo:hi], preferred_element_type=jnp.float32)
        ctx_scratch[:, lo:hi] = ctx.reshape(BT, dh)

    attn = jnp.dot(ctx_scratch[...].astype(jnp.bfloat16), wo_ref[...],
                   preferred_element_type=jnp.float32) + bo_ref[...]
    x = layer_norm(x + attn, ln1g_ref[...], ln1b_ref[...])

    # ---- feed-forward block (GELU in f32) ----
    mid = jnp.dot(x.astype(jnp.bfloat16), wi_ref[...],
                  preferred_element_type=jnp.float32) + bi_ref[...]
    mid = jax.nn.gelu(mid, approximate=True)
    ff = jnp.dot(mid.astype(jnp.bfloat16), wf_ref[...],
                 preferred_element_type=jnp.float32) + bf_ref[...]
    x = layer_norm(x + ff, ln2g_ref[...], ln2b_ref[...])
    x_scratch[...] = x

    # ---- last step: pooler tanh(dense([CLS])) + sigmoid(Linear(H, 1)) ----
    @pl.when(l == n_layers - 1)
    def _():
        cls = x.reshape(B, T, H)[:, 0:1, :].reshape(B, H)
        pooled = jnp.tanh(jnp.dot(cls.astype(jnp.bfloat16), wp_ref[...],
                                  preferred_element_type=jnp.float32)
                          + bp_ref[...])
        # classification head as a lane reduce (keep the N=1 job off the MXU)
        logits = jnp.sum(pooled * wc_ref[...], axis=-1, keepdims=True) + bc_ref[...]
        out_ref[...] = jax.nn.sigmoid(logits)


def hr_bert_forward(input_ids, att_mask, params, *, num_heads):
    """input_ids: (B, T) int32; att_mask: (B, T) {0,1} int32 -> (B, 1) f32."""
    word_emb = params["word_emb"]                        # (V, H)
    pos_emb = params["pos_emb"]                          # (maxT, H)
    type_emb = params["type_emb"]                        # (2, H)
    B, T = input_ids.shape
    H = word_emb.shape[1]
    L = params["wqkv"].shape[0]
    F = params["wi"].shape[2]

    # Glue in plain JAX: embedding gathers + additive attention-mask bias.
    x = (jnp.take(word_emb, input_ids, axis=0)
         + pos_emb[:T][None, :, :]
         + type_emb[0][None, None, :]).astype(jnp.float32)       # (B, T, H)
    bias = (1.0 - att_mask.astype(jnp.float32)) * -10000.0       # (B, T)

    args = (x, bias, params["emb_ln_g"], params["emb_ln_b"],
            params["wqkv"], params["bqkv"], params["wo"], params["bo"],
            params["ln1_g"], params["ln1_b"],
            params["wi"], params["bi"], params["wf"], params["bf"],
            params["ln2_g"], params["ln2_b"],
            params["wp"], params["bp"], params["wc"], params["bc"])

    grid_spec = pltpu.PrefetchScalarGridSpec(
        num_scalar_prefetch=0,
        grid=(L,),                                   # stream weights per layer
        in_specs=[
            pl.BlockSpec((B, T, H), lambda l: (0, 0, 0)),         # embeddings
            pl.BlockSpec((B, T), lambda l: (0, 0)),               # mask bias
            pl.BlockSpec((1, H), lambda l: (0, 0)),               # emb LN gamma
            pl.BlockSpec((1, H), lambda l: (0, 0)),               # emb LN beta
            pl.BlockSpec((None, H, 3 * H), lambda l: (l, 0, 0)),  # wqkv (bf16)
            pl.BlockSpec((None, 1, 3 * H), lambda l: (l, 0, 0)),  # bqkv
            pl.BlockSpec((None, H, H), lambda l: (l, 0, 0)),      # wo (bf16)
            pl.BlockSpec((None, 1, H), lambda l: (l, 0, 0)),      # bo
            pl.BlockSpec((None, 1, H), lambda l: (l, 0, 0)),      # ln1 gamma
            pl.BlockSpec((None, 1, H), lambda l: (l, 0, 0)),      # ln1 beta
            pl.BlockSpec((None, H, F), lambda l: (l, 0, 0)),      # wi (bf16)
            pl.BlockSpec((None, 1, F), lambda l: (l, 0, 0)),      # bi
            pl.BlockSpec((None, F, H), lambda l: (l, 0, 0)),      # wf (bf16)
            pl.BlockSpec((None, 1, H), lambda l: (l, 0, 0)),      # bf
            pl.BlockSpec((None, 1, H), lambda l: (l, 0, 0)),      # ln2 gamma
            pl.BlockSpec((None, 1, H), lambda l: (l, 0, 0)),      # ln2 beta
            pl.BlockSpec((H, H), lambda l: (0, 0)),               # pooler W
            pl.BlockSpec((1, H), lambda l: (0, 0)),               # pooler b
            pl.BlockSpec((1, H), lambda l: (0, 0)),               # classifier w
            pl.BlockSpec((1, 1), lambda l: (0, 0)),               # classifier b
        ],
        out_specs=pl.BlockSpec((B, 1), lambda l: (0, 0)),
        scratch_shapes=[pltpu.VMEM((B * T, H), jnp.float32),   # resident x
                        pltpu.VMEM((B * T, H), jnp.float32)],  # per-layer ctx
    )

    # Advisory cost estimate so XLA schedules the gather / mask prep around us.
    BT = B * T
    flops = 2 * L * (BT * H * 3 * H + BT * H * H + 2 * BT * H * F
                     + 2 * B * T * T * H) + 2 * B * H * H
    transcendentals = L * (B * num_heads * T * T + BT * F) + B * (H + 1)
    bytes_accessed = (sum(int(a.size) * a.dtype.itemsize for a in args)
                      + BT * H * 4 + B * 4)

    kernel = pl.pallas_call(
        functools.partial(hr_bert_kernel, num_heads),
        grid_spec=grid_spec,
        out_shape=jax.ShapeDtypeStruct((B, 1), jnp.float32),
        compiler_params=pltpu.CompilerParams(
            dimension_semantics=("arbitrary",),      # layer axis is sequential
            vmem_limit_bytes=48 * 1024 * 1024),      # headroom on all gens (<64MiB)
        cost_estimate=pl.CostEstimate(flops=int(flops),
                                      transcendentals=int(transcendentals),
                                      bytes_accessed=int(bytes_accessed)),
    )
    return kernel(*args)


def init_params(key, vocab, hidden, ffn, layers, max_pos):
    """Deterministic synthetic BERT-style parameters.
    Matmul weights are pre-transposed for the `x @ W` layout and stored bf16;
    biases / LayerNorm params stay f32 (elementwise path)."""
    H, F, L = hidden, ffn, layers
    ks = iter(jax.random.split(key, 32))
    bf16 = jnp.bfloat16

    def rnd(shape, scale=0.05, dtype=jnp.float32):
        return (scale * jax.random.normal(next(ks), shape)).astype(dtype)

    return {
        # embeddings
        "word_emb": rnd((vocab, H), 0.5),
        "pos_emb":  rnd((max_pos, H), 0.5),
        "type_emb": rnd((2, H), 0.5),
        "emb_ln_g": jnp.ones((1, H), jnp.float32),
        "emb_ln_b": jnp.zeros((1, H), jnp.float32),
        # encoder layers, stacked along a leading layer axis (fused QKV)
        "wqkv": rnd((L, H, 3 * H), dtype=bf16), "bqkv": rnd((L, 1, 3 * H)),
        "wo": rnd((L, H, H), dtype=bf16), "bo": rnd((L, 1, H)),
        "ln1_g": jnp.ones((L, 1, H), jnp.float32),
        "ln1_b": jnp.zeros((L, 1, H), jnp.float32),
        "wi": rnd((L, H, F), dtype=bf16), "bi": rnd((L, 1, F)),
        "wf": rnd((L, F, H), dtype=bf16), "bf": rnd((L, 1, H)),
        "ln2_g": jnp.ones((L, 1, H), jnp.float32),
        "ln2_b": jnp.zeros((L, 1, H), jnp.float32),
        # pooler + classification head (classifier stored as a (1, H) row)
        "wp": rnd((H, H), dtype=bf16), "bp": rnd((1, H)),
        "wc": rnd((1, H)), "bc": rnd((1, 1)),
    }


if __name__ == "__main__":
    key = jax.random.PRNGKey(0)
    B, T, V, H, NH, F, L = 2, 8, 50, 32, 4, 64, 2

    k_ids, k_par = jax.random.split(key)
    input_ids = jax.random.randint(k_ids, (B, T), 0, V, dtype=jnp.int32)
    att_mask = jnp.array([[1, 1, 1, 1, 1, 1, 1, 1],
                          [1, 1, 1, 1, 1, 0, 0, 0]], dtype=jnp.int32)

    params = init_params(k_par, V, H, F, L, max_pos=T)

    fwd = jax.jit(functools.partial(hr_bert_forward, num_heads=NH))
    out = fwd(input_ids, att_mask, params)
    out = jax.block_until_ready(out)

    assert out.shape == (B, 1), out.shape
    assert bool(jnp.all(jnp.isfinite(out)))
    assert bool(jnp.all((out > 0.0) & (out < 1.0)))
    print("KERNEL_OK")
</pallas_src>

<mosaic_0001>
module attributes {stable_mosaic.version = 11 : i64} {
  func.func @hr_bert_kernel(%arg0: i32, %arg1: memref<2x8x32xf32, #tpu.memory_space<vmem>>, %arg2: memref<2x8xf32, #tpu.memory_space<vmem>>, %arg3: memref<1x32xf32, #tpu.memory_space<vmem>>, %arg4: memref<1x32xf32, #tpu.memory_space<vmem>>, %arg5: memref<1x32x96xbf16, #tpu.memory_space<vmem>>, %arg6: memref<1x1x96xf32, #tpu.memory_space<vmem>>, %arg7: memref<1x32x32xbf16, #tpu.memory_space<vmem>>, %arg8: memref<1x1x32xf32, #tpu.memory_space<vmem>>, %arg9: memref<1x1x32xf32, #tpu.memory_space<vmem>>, %arg10: memref<1x1x32xf32, #tpu.memory_space<vmem>>, %arg11: memref<1x32x64xbf16, #tpu.memory_space<vmem>>, %arg12: memref<1x1x64xf32, #tpu.memory_space<vmem>>, %arg13: memref<1x64x32xbf16, #tpu.memory_space<vmem>>, %arg14: memref<1x1x32xf32, #tpu.memory_space<vmem>>, %arg15: memref<1x1x32xf32, #tpu.memory_space<vmem>>, %arg16: memref<1x1x32xf32, #tpu.memory_space<vmem>>, %arg17: memref<32x32xbf16, #tpu.memory_space<vmem>>, %arg18: memref<1x32xf32, #tpu.memory_space<vmem>>, %arg19: memref<1x32xf32, #tpu.memory_space<vmem>>, %arg20: memref<1x1xf32, #tpu.memory_space<vmem>>, %arg21: memref<2x1xf32, #tpu.memory_space<vmem>>, %arg22: memref<16x32xf32, #tpu.memory_space<vmem>>, %arg23: memref<16x32xf32, #tpu.memory_space<vmem>>) attributes {dimension_semantics = [#tpu.dimension_semantics<arbitrary>], iteration_bounds = array<i64: 2>, scalar_prefetch = 0 : i64, scratch_operands = 2 : i64, tpu.core_type = #tpu.core_type<tc>, window_params = [{pipeline_mode = #tpu.pipeline_mode<synchronous>, transform_indices = @transform_0, window_bounds = array<i64: 2, 8, 32>}, {pipeline_mode = #tpu.pipeline_mode<synchronous>, transform_indices = @transform_1, window_bounds = array<i64: 2, 8>}, {pipeline_mode = #tpu.pipeline_mode<synchronous>, transform_indices = @transform_2, window_bounds = array<i64: 1, 32>}, {pipeline_mode = #tpu.pipeline_mode<synchronous>, transform_indices = @transform_3, window_bounds = array<i64: 1, 32>}, {transform_indices = @transform_4, window_bounds = array<i64: 1, 32, 96>}, {transform_indices = @transform_5, window_bounds = array<i64: 1, 1, 96>}, {transform_indices = @transform_6, window_bounds = array<i64: 1, 32, 32>}, {transform_indices = @transform_7, window_bounds = array<i64: 1, 1, 32>}, {transform_indices = @transform_8, window_bounds = array<i64: 1, 1, 32>}, {transform_indices = @transform_9, window_bounds = array<i64: 1, 1, 32>}, {transform_indices = @transform_10, window_bounds = array<i64: 1, 32, 64>}, {transform_indices = @transform_11, window_bounds = array<i64: 1, 1, 64>}, {transform_indices = @transform_12, window_bounds = array<i64: 1, 64, 32>}, {transform_indices = @transform_13, window_bounds = array<i64: 1, 1, 32>}, {transform_indices = @transform_14, window_bounds = array<i64: 1, 1, 32>}, {transform_indices = @transform_15, window_bounds = array<i64: 1, 1, 32>}, {pipeline_mode = #tpu.pipeline_mode<synchronous>, transform_indices = @transform_16, window_bounds = array<i64: 32, 32>}, {pipeline_mode = #tpu.pipeline_mode<synchronous>, transform_indices = @transform_17, window_bounds = array<i64: 1, 32>}, {pipeline_mode = #tpu.pipeline_mode<synchronous>, transform_indices = @transform_18, window_bounds = array<i64: 1, 32>}, {pipeline_mode = #tpu.pipeline_mode<synchronous>, transform_indices = @transform_19, window_bounds = array<i64: 1, 1>}, {pipeline_mode = #tpu.pipeline_mode<synchronous>, transform_indices = @transform_20, window_bounds = array<i64: 2, 1>}]} {
    %c0_i32 = arith.constant 0 : i32
    %0 = arith.cmpi eq, %arg0, %c0_i32 : i32
    %1 = arith.extui %0 : i1 to i32
    %c0_i32_0 = arith.constant 0 : i32
    %2 = arith.cmpi ne, %1, %c0_i32_0 : i32
    scf.if %2 {
      %c0_87 = arith.constant 0 : index
      %c0_88 = arith.constant 0 : index
      %c0_89 = arith.constant 0 : index
      %203 = vector.load %arg1[%c0_87, %c0_88, %c0_89] : memref<2x8x32xf32, #tpu.memory_space<vmem>>, vector<2x8x32xf32>
      %204 = vector.shape_cast %203 : vector<2x8x32xf32> to vector<16x32xf32>
      %c0_90 = arith.constant 0 : index
      %c0_91 = arith.constant 0 : index
      %205 = vector.load %arg3[%c0_90, %c0_91] : memref<1x32xf32, #tpu.memory_space<vmem>>, vector<1x32xf32>
      %c0_92 = arith.constant 0 : index
      %c0_93 = arith.constant 0 : index
      %206 = vector.load %arg4[%c0_92, %c0_93] : memref<1x32xf32, #tpu.memory_space<vmem>>, vector<1x32xf32>
      %cst_94 = arith.constant dense<0.000000e+00> : vector<16xf32>
      %207 = vector.multi_reduction <add>, %204, %cst_94 [1] : vector<16x32xf32> to vector<16xf32>
      %208 = vector.shape_cast %207 : vector<16xf32> to vector<16x1xf32>
      %cst_95 = arith.constant 3.200000e+01 : f32
      %209 = vector.broadcast %cst_95 : f32 to vector<16x1xf32>
      %210 = arith.divf %208, %209 : vector<16x1xf32>
      %211 = vector.broadcast %210 : vector<16x1xf32> to vector<16x32xf32>
      %212 = arith.subf %204, %211 : vector<16x32xf32>
      %213 = arith.mulf %212, %212 : vector<16x32xf32>
      %cst_96 = arith.constant dense<0.000000e+00> : vector<16xf32>
      %214 = vector.multi_reduction <add>, %213, %cst_96 [1] : vector<16x32xf32> to vector<16xf32>
      %215 = vector.shape_cast %214 : vector<16xf32> to vector<16x1xf32>
      %cst_97 = arith.constant 3.200000e+01 : f32
      %216 = vector.broadcast %cst_97 : f32 to vector<16x1xf32>
      %217 = arith.divf %215, %216 : vector<16x1xf32>
      %cst_98 = arith.constant 9.99999996E-13 : f32
      %218 = vector.broadcast %cst_98 : f32 to vector<16x1xf32>
      %219 = arith.addf %217, %218 : vector<16x1xf32>
      %220 = math.rsqrt %219 : vector<16x1xf32>
      %221 = vector.broadcast %220 : vector<16x1xf32> to vector<16x32xf32>
      %222 = arith.mulf %212, %221 : vector<16x32xf32>
      %223 = vector.broadcast %205 : vector<1x32xf32> to vector<16x32xf32>
      %224 = arith.mulf %222, %223 : vector<16x32xf32>
      %225 = vector.broadcast %206 : vector<1x32xf32> to vector<16x32xf32>
      %226 = arith.addf %224, %225 : vector<16x32xf32>
      %c0_99 = arith.constant 0 : index
      %c0_100 = arith.constant 0 : index
      %227 = vector.load %arg22[%c0_99, %c0_100] : memref<16x32xf32, #tpu.memory_space<vmem>>, vector<16x32xf32>
      tpu.vector_store %arg22[%c0_99, %c0_100], %226 {strides = array<i32>} : memref<16x32xf32, #tpu.memory_space<vmem>>, vector<16x32xf32>,
    } else {
    }
    %c0 = arith.constant 0 : index
    %c0_1 = arith.constant 0 : index
    %3 = vector.load %arg22[%c0, %c0_1] : memref<16x32xf32, #tpu.memory_space<vmem>>, vector<16x32xf32>
    %4 = arith.truncf %3 : vector<16x32xf32> to vector<16x32xbf16>
    %c0_2 = arith.constant 0 : index
    %c0_3 = arith.constant 0 : index
    %c0_4 = arith.constant 0 : index
    %5 = vector.load %arg5[%c0_2, %c0_3, %c0_4] : memref<1x32x96xbf16, #tpu.memory_space<vmem>>, vector<1x32x96xbf16>
    %6 = vector.shape_cast %5 : vector<1x32x96xbf16> to vector<32x96xbf16>
    %cst = arith.constant dense<0.000000e+00> : vector<16x96xf32>
    %7 = tpu.matmul %4, %6, %cst {dimension_numbers = #tpu.dot_dimension_numbers<[1], [0], [0], [1], [0, 0, 1, 1], [], []>} : vector<16x32xbf16>, vector<32x96xbf16>, vector<16x96xf32> -> vector<16x96xf32>
    %c0_5 = arith.constant 0 : index
    %c0_6 = arith.constant 0 : index
    %c0_7 = arith.constant 0 : index
    %8 = vector.load %arg6[%c0_5, %c0_6, %c0_7] : memref<1x1x96xf32, #tpu.memory_space<vmem>>, vector<1x1x96xf32>
    %9 = vector.shape_cast %8 : vector<1x1x96xf32> to vector<1x96xf32>
    %10 = vector.broadcast %9 : vector<1x96xf32> to vector<16x96xf32>
    %11 = arith.addf %7, %10 : vector<16x96xf32>
    %12 = vector.extract_strided_slice %11 {offsets = [0, 0], sizes = [16, 32], strides = [1, 1]} : vector<16x96xf32> to vector<16x32xf32>
    %13 = vector.shape_cast %12 : vector<16x32xf32> to vector<2x8x32xf32>
    %14 = arith.truncf %13 : vector<2x8x32xf32> to vector<2x8x32xbf16>
    %15 = vector.extract_strided_slice %11 {offsets = [0, 32], sizes = [16, 32], strides = [1, 1]} : vector<16x96xf32> to vector<16x32xf32>
    %16 = vector.shape_cast %15 : vector<16x32xf32> to vector<2x8x32xf32>
    %17 = arith.truncf %16 : vector<2x8x32xf32> to vector<2x8x32xbf16>
    %18 = vector.extract_strided_slice %11 {offsets = [0, 64], sizes = [16, 32], strides = [1, 1]} : vector<16x96xf32> to vector<16x32xf32>
    %19 = vector.shape_cast %18 : vector<16x32xf32> to vector<2x8x32xf32>
    %20 = arith.truncf %19 : vector<2x8x32xf32> to vector<2x8x32xbf16>
    %c0_8 = arith.constant 0 : index
    %c0_9 = arith.constant 0 : index
    %21 = vector.load %arg2[%c0_8, %c0_9] : memref<2x8xf32, #tpu.memory_space<vmem>>, vector<2x8xf32>
    %22 = vector.shape_cast %21 : vector<2x8xf32> to vector<2x1x8xf32>
    %23 = vector.extract_strided_slice %14 {offsets = [0, 0, 0], sizes = [2, 8, 8], strides = [1, 1, 1]} : vector<2x8x32xbf16> to vector<2x8x8xbf16>
    %24 = vector.extract_strided_slice %17 {offsets = [0, 0, 0], sizes = [2, 8, 8], strides = [1, 1, 1]} : vector<2x8x32xbf16> to vector<2x8x8xbf16>
    "tpu.trace_start"() <{level = 10 : i32, message = "bqd,bkd->bqk"}> : () -> ()
    %cst_10 = arith.constant dense<0.000000e+00> : vector<2x8x8xf32>
    %25 = tpu.matmul %23, %24, %cst_10 {dimension_numbers = #tpu.dot_dimension_numbers<[2], [2], [1], [1], [0, 0, 0, 1, 1, 1], [0], [0]>} : vector<2x8x8xbf16>, vector<2x8x8xbf16>, vector<2x8x8xf32> -> vector<2x8x8xf32>
    "tpu.trace_stop"() : () -> ()
    %cst_11 = arith.constant 0.353553385 : f32
    %26 = vector.broadcast %cst_11 : f32 to vector<2x8x8xf32>
    %27 = arith.mulf %25, %26 : vector<2x8x8xf32>
    %28 = vector.broadcast %22 : vector<2x1x8xf32> to vector<2x8x8xf32>
    %29 = arith.addf %27, %28 : vector<2x8x8xf32>
    %cst_12 = arith.constant dense<0xFF800000> : vector<2x8xf32>
    %30 = vector.multi_reduction <maximumf>, %29, %cst_12 [2] : vector<2x8x8xf32> to vector<2x8xf32>
    %31 = vector.shape_cast %30 : vector<2x8xf32> to vector<2x8x1xf32>
    %32 = vector.broadcast %31 : vector<2x8x1xf32> to vector<2x8x8xf32>
    %33 = arith.subf %29, %32 : vector<2x8x8xf32>
    %34 = math.exp %33 : vector<2x8x8xf32>
    %cst_13 = arith.constant dense<0.000000e+00> : vector<2x8xf32>
    %35 = vector.multi_reduction <add>, %34, %cst_13 [2] : vector<2x8x8xf32> to vector<2x8xf32>
    %36 = vector.shape_cast %35 : vector<2x8xf32> to vector<2x8x1xf32>
    %37 = tpu.reciprocal %36 {approx = true} : vector<2x8x1xf32> -> vector<2x8x1xf32>
    %38 = vector.broadcast %37 : vector<2x8x1xf32> to vector<2x8x8xf32>
    %39 = arith.mulf %34, %38 : vector<2x8x8xf32>
    %40 = arith.truncf %39 : vector<2x8x8xf32> to vector<2x8x8xbf16>
    %41 = vector.extract_strided_slice %20 {offsets = [0, 0, 0], sizes = [2, 8, 8], strides = [1, 1, 1]} : vector<2x8x32xbf16> to vector<2x8x8xbf16>
    "tpu.trace_start"() <{level = 10 : i32, message = "bqk,bkd->bqd"}> : () -> ()
    %cst_14 = arith.constant dense<0.000000e+00> : vector<2x8x8xf32>
    %42 = tpu.matmul %40, %41, %cst_14 {dimension_numbers = #tpu.dot_dimension_numbers<[2], [1], [1], [2], [0, 0, 0, 1, 1, 2], [0], [0]>} : vector<2x8x8xbf16>, vector<2x8x8xbf16>, vector<2x8x8xf32> -> vector<2x8x8xf32>
    "tpu.trace_stop"() : () -> ()
    %43 = vector.shape_cast %42 : vector<2x8x8xf32> to vector<16x8xf32>
    %c0_15 = arith.constant 0 : index
    %c0_16 = arith.constant 0 : index
    %44 = vector.load %arg23[%c0_15, %c0_16] : memref<16x32xf32, #tpu.memory_space<vmem>>, vector<16x8xf32>
    tpu.vector_store %arg23[%c0_15, %c0_16], %43 {strides = array<i32>} : memref<16x32xf32, #tpu.memory_space<vmem>>, vector<16x8xf32>,
    %45 = vector.extract_strided_slice %14 {offsets = [0, 0, 8], sizes = [2, 8, 8], strides = [1, 1, 1]} : vector<2x8x32xbf16> to vector<2x8x8xbf16>
    %46 = vector.extract_strided_slice %17 {offsets = [0, 0, 8], sizes = [2, 8, 8], strides = [1, 1, 1]} : vector<2x8x32xbf16> to vector<2x8x8xbf16>
    "tpu.trace_start"() <{level = 10 : i32, message = "bqd,bkd->bqk"}> : () -> ()
    %cst_17 = arith.constant dense<0.000000e+00> : vector<2x8x8xf32>
    %47 = tpu.matmul %45, %46, %cst_17 {dimension_numbers = #tpu.dot_dimension_numbers<[2], [2], [1], [1], [0, 0, 0, 1, 1, 1], [0], [0]>} : vector<2x8x8xbf16>, vector<2x8x8xbf16>, vector<2x8x8xf32> -> vector<2x8x8xf32>
    "tpu.trace_stop"() : () -> ()
    %cst_18 = arith.constant 0.353553385 : f32
    %48 = vector.broadcast %cst_18 : f32 to vector<2x8x8xf32>
    %49 = arith.mulf %47, %48 : vector<2x8x8xf32>
    %50 = vector.broadcast %22 : vector<2x1x8xf32> to vector<2x8x8xf32>
    %51 = arith.addf %49, %50 : vector<2x8x8xf32>
    %cst_19 = arith.constant dense<0xFF800000> : vector<2x8xf32>
    %52 = vector.multi_reduction <maximumf>, %51, %cst_19 [2] : vector<2x8x8xf32> to vector<2x8xf32>
    %53 = vector.shape_cast %52 : vector<2x8xf32> to vector<2x8x1xf32>
    %54 = vector.broadcast %53 : vector<2x8x1xf32> to vector<2x8x8xf32>
    %55 = arith.subf %51, %54 : vector<2x8x8xf32>
    %56 = math.exp %55 : vector<2x8x8xf32>
    %cst_20 = arith.constant dense<0.000000e+00> : vector<2x8xf32>
    %57 = vector.multi_reduction <add>, %56, %cst_20 [2] : vector<2x8x8xf32> to vector<2x8xf32>
    %58 = vector.shape_cast %57 : vector<2x8xf32> to vector<2x8x1xf32>
    %59 = tpu.reciprocal %58 {approx = true} : vector<2x8x1xf32> -> vector<2x8x1xf32>
    %60 = vector.broadcast %59 : vector<2x8x1xf32> to vector<2x8x8xf32>
    %61 = arith.mulf %56, %60 : vector<2x8x8xf32>
    %62 = arith.truncf %61 : vector<2x8x8xf32> to vector<2x8x8xbf16>
    %63 = vector.extract_strided_slice %20 {offsets = [0, 0, 8], sizes = [2, 8, 8], strides = [1, 1, 1]} : vector<2x8x32xbf16> to vector<2x8x8xbf16>
    "tpu.trace_start"() <{level = 10 : i32, message = "bqk,bkd->bqd"}> : () -> ()
    %cst_21 = arith.constant dense<0.000000e+00> : vector<2x8x8xf32>
    %64 = tpu.matmul %62, %63, %cst_21 {dimension_numbers = #tpu.dot_dimension_numbers<[2], [1], [1], [2], [0, 0, 0, 1, 1, 2], [0], [0]>} : vector<2x8x8xbf16>, vector<2x8x8xbf16>, vector<2x8x8xf32> -> vector<2x8x8xf32>
    "tpu.trace_stop"() : () -> ()
    %65 = vector.shape_cast %64 : vector<2x8x8xf32> to vector<16x8xf32>
    %c0_22 = arith.constant 0 : index
    %c8 = arith.constant 8 : index
    %66 = vector.load %arg23[%c0_22, %c8] : memref<16x32xf32, #tpu.memory_space<vmem>>, vector<16x8xf32>
    tpu.vector_store %arg23[%c0_22, %c8], %65 {strides = array<i32>} : memref<16x32xf32, #tpu.memory_space<vmem>>, vector<16x8xf32>,
    %67 = vector.extract_strided_slice %14 {offsets = [0, 0, 16], sizes = [2, 8, 8], strides = [1, 1, 1]} : vector<2x8x32xbf16> to vector<2x8x8xbf16>
    %68 = vector.extract_strided_slice %17 {offsets = [0, 0, 16], sizes = [2, 8, 8], strides = [1, 1, 1]} : vector<2x8x32xbf16> to vector<2x8x8xbf16>
    "tpu.trace_start"() <{level = 10 : i32, message = "bqd,bkd->bqk"}> : () -> ()
    %cst_23 = arith.constant dense<0.000000e+00> : vector<2x8x8xf32>
    %69 = tpu.matmul %67, %68, %cst_23 {dimension_numbers = #tpu.dot_dimension_numbers<[2], [2], [1], [1], [0, 0, 0, 1, 1, 1], [0], [0]>} : vector<2x8x8xbf16>, vector<2x8x8xbf16>, vector<2x8x8xf32> -> vector<2x8x8xf32>
    "tpu.trace_stop"() : () -> ()
    %cst_24 = arith.constant 0.353553385 : f32
    %70 = vector.broadcast %cst_24 : f32 to vector<2x8x8xf32>
    %71 = arith.mulf %69, %70 : vector<2x8x8xf32>
    %72 = vector.broadcast %22 : vector<2x1x8xf32> to vector<2x8x8xf32>
    %73 = arith.addf %71, %72 : vector<2x8x8xf32>
    %cst_25 = arith.constant dense<0xFF800000> : vector<2x8xf32>
    %74 = vector.multi_reduction <maximumf>, %73, %cst_25 [2] : vector<2x8x8xf32> to vector<2x8xf32>
    %75 = vector.shape_cast %74 : vector<2x8xf32> to vector<2x8x1xf32>
    %76 = vector.broadcast %75 : vector<2x8x1xf32> to vector<2x8x8xf32>
    %77 = arith.subf %73, %76 : vector<2x8x8xf32>
    %78 = math.exp %77 : vector<2x8x8xf32>
    %cst_26 = arith.constant dense<0.000000e+00> : vector<2x8xf32>
    %79 = vector.multi_reduction <add>, %78, %cst_26 [2] : vector<2x8x8xf32> to vector<2x8xf32>
    %80 = vector.shape_cast %79 : vector<2x8xf32> to vector<2x8x1xf32>
    %81 = tpu.reciprocal %80 {approx = true} : vector<2x8x1xf32> -> vector<2x8x1xf32>
    %82 = vector.broadcast %81 : vector<2x8x1xf32> to vector<2x8x8xf32>
    %83 = arith.mulf %78, %82 : vector<2x8x8xf32>
    %84 = arith.truncf %83 : vector<2x8x8xf32> to vector<2x8x8xbf16>
    %85 = vector.extract_strided_slice %20 {offsets = [0, 0, 16], sizes = [2, 8, 8], strides = [1, 1, 1]} : vector<2x8x32xbf16> to vector<2x8x8xbf16>
    "tpu.trace_start"() <{level = 10 : i32, message = "bqk,bkd->bqd"}> : () -> ()
    %cst_27 = arith.constant dense<0.000000e+00> : vector<2x8x8xf32>
    %86 = tpu.matmul %84, %85, %cst_27 {dimension_numbers = #tpu.dot_dimension_numbers<[2], [1], [1], [2], [0, 0, 0, 1, 1, 2], [0], [0]>} : vector<2x8x8xbf16>, vector<2x8x8xbf16>, vector<2x8x8xf32> -> vector<2x8x8xf32>
    "tpu.trace_stop"() : () -> ()
    %87 = vector.shape_cast %86 : vector<2x8x8xf32> to vector<16x8xf32>
    %c0_28 = arith.constant 0 : index
    %c16 = arith.constant 16 : index
    %88 = vector.load %arg23[%c0_28, %c16] : memref<16x32xf32, #tpu.memory_space<vmem>>, vector<16x8xf32>
    tpu.vector_store %arg23[%c0_28, %c16], %87 {strides = array<i32>} : memref<16x32xf32, #tpu.memory_space<vmem>>, vector<16x8xf32>,
    %89 = vector.extract_strided_slice %14 {offsets = [0, 0, 24], sizes = [2, 8, 8], strides = [1, 1, 1]} : vector<2x8x32xbf16> to vector<2x8x8xbf16>
    %90 = vector.extract_strided_slice %17 {offsets = [0, 0, 24], sizes = [2, 8, 8], strides = [1, 1, 1]} : vector<2x8x32xbf16> to vector<2x8x8xbf16>
    "tpu.trace_start"() <{level = 10 : i32, message = "bqd,bkd->bqk"}> : () -> ()
    %cst_29 = arith.constant dense<0.000000e+00> : vector<2x8x8xf32>
    %91 = tpu.matmul %89, %90, %cst_29 {dimension_numbers = #tpu.dot_dimension_numbers<[2], [2], [1], [1], [0, 0, 0, 1, 1, 1], [0], [0]>} : vector<2x8x8xbf16>, vector<2x8x8xbf16>, vector<2x8x8xf32> -> vector<2x8x8xf32>
    "tpu.trace_stop"() : () -> ()
    %cst_30 = arith.constant 0.353553385 : f32
    %92 = vector.broadcast %cst_30 : f32 to vector<2x8x8xf32>
    %93 = arith.mulf %91, %92 : vector<2x8x8xf32>
    %94 = vector.broadcast %22 : vector<2x1x8xf32> to vector<2x8x8xf32>
    %95 = arith.addf %93, %94 : vector<2x8x8xf32>
    %cst_31 = arith.constant dense<0xFF800000> : vector<2x8xf32>
    %96 = vector.multi_reduction <maximumf>, %95, %cst_31 [2] : vector<2x8x8xf32> to vector<2x8xf32>
    %97 = vector.shape_cast %96 : vector<2x8xf32> to vector<2x8x1xf32>
    %98 = vector.broadcast %97 : vector<2x8x1xf32> to vector<2x8x8xf32>
    %99 = arith.subf %95, %98 : vector<2x8x8xf32>
    %100 = math.exp %99 : vector<2x8x8xf32>
    %cst_32 = arith.constant dense<0.000000e+00> : vector<2x8xf32>
    %101 = vector.multi_reduction <add>, %100, %cst_32 [2] : vector<2x8x8xf32> to vector<2x8xf32>
    %102 = vector.shape_cast %101 : vector<2x8xf32> to vector<2x8x1xf32>
    %103 = tpu.reciprocal %102 {approx = true} : vector<2x8x1xf32> -> vector<2x8x1xf32>
    %104 = vector.broadcast %103 : vector<2x8x1xf32> to vector<2x8x8xf32>
    %105 = arith.mulf %100, %104 : vector<2x8x8xf32>
    %106 = arith.truncf %105 : vector<2x8x8xf32> to vector<2x8x8xbf16>
    %107 = vector.extract_strided_slice %20 {offsets = [0, 0, 24], sizes = [2, 8, 8], strides = [1, 1, 1]} : vector<2x8x32xbf16> to vector<2x8x8xbf16>
    "tpu.trace_start"() <{level = 10 : i32, message = "bqk,bkd->bqd"}> : () -> ()
    %cst_33 = arith.constant dense<0.000000e+00> : vector<2x8x8xf32>
    %108 = tpu.matmul %106, %107, %cst_33 {dimension_numbers = #tpu.dot_dimension_numbers<[2], [1], [1], [2], [0, 0, 0, 1, 1, 2], [0], [0]>} : vector<2x8x8xbf16>, vector<2x8x8xbf16>, vector<2x8x8xf32> -> vector<2x8x8xf32>
    "tpu.trace_stop"() : () -> ()
    %109 = vector.shape_cast %108 : vector<2x8x8xf32> to vector<16x8xf32>
    %c0_34 = arith.constant 0 : index
    %c24 = arith.constant 24 : index
    %110 = vector.load %arg23[%c0_34, %c24] : memref<16x32xf32, #tpu.memory_space<vmem>>, vector<16x8xf32>
    tpu.vector_store %arg23[%c0_34, %c24], %109 {strides = array<i32>} : memref<16x32xf32, #tpu.memory_space<vmem>>, vector<16x8xf32>,
    %c0_35 = arith.constant 0 : index
    %c0_36 = arith.constant 0 : index
    %111 = vector.load %arg23[%c0_35, %c0_36] : memref<16x32xf32, #tpu.memory_space<vmem>>, vector<16x32xf32>
    %112 = arith.truncf %111 : vector<16x32xf32> to vector<16x32xbf16>
    %c0_37 = arith.constant 0 : index
    %c0_38 = arith.constant 0 : index
    %c0_39 = arith.constant 0 : index
    %113 = vector.load %arg7[%c0_37, %c0_38, %c0_39] : memref<1x32x32xbf16, #tpu.memory_space<vmem>>, vector<1x32x32xbf16>
    %114 = vector.shape_cast %113 : vector<1x32x32xbf16> to vector<32x32xbf16>
    %cst_40 = arith.constant dense<0.000000e+00> : vector<16x32xf32>
    %115 = tpu.matmul %112, %114, %cst_40 {dimension_numbers = #tpu.dot_dimension_numbers<[1], [0], [0], [1], [0, 0, 1, 1], [], []>} : vector<16x32xbf16>, vector<32x32xbf16>, vector<16x32xf32> -> vector<16x32xf32>
    %c0_41 = arith.constant 0 : index
    %c0_42 = arith.constant 0 : index
    %c0_43 = arith.constant 0 : index
    %116 = vector.load %arg8[%c0_41, %c0_42, %c0_43] : memref<1x1x32xf32, #tpu.memory_space<vmem>>, vector<1x1x32xf32>
    %117 = vector.shape_cast %116 : vector<1x1x32xf32> to vector<1x32xf32>
    %118 = vector.broadcast %117 : vector<1x32xf32> to vector<16x32xf32>
    %119 = arith.addf %115, %118 : vector<16x32xf32>
    %120 = arith.addf %3, %119 : vector<16x32xf32>
    %c0_44 = arith.constant 0 : index
    %c0_45 = arith.constant 0 : index
    %c0_46 = arith.constant 0 : index
    %121 = vector.load %arg9[%c0_44, %c0_45, %c0_46] : memref<1x1x32xf32, #tpu.memory_space<vmem>>, vector<1x1x32xf32>
    %122 = vector.shape_cast %121 : vector<1x1x32xf32> to vector<1x32xf32>
    %c0_47 = arith.constant 0 : index
    %c0_48 = arith.constant 0 : index
    %c0_49 = arith.constant 0 : index
    %123 = vector.load %arg10[%c0_47, %c0_48, %c0_49] : memref<1x1x32xf32, #tpu.memory_space<vmem>>, vector<1x1x32xf32>
    %124 = vector.shape_cast %123 : vector<1x1x32xf32> to vector<1x32xf32>
    %cst_50 = arith.constant dense<0.000000e+00> : vector<16xf32>
    %125 = vector.multi_reduction <add>, %120, %cst_50 [1] : vector<16x32xf32> to vector<16xf32>
    %126 = vector.shape_cast %125 : vector<16xf32> to vector<16x1xf32>
    %cst_51 = arith.constant 3.200000e+01 : f32
    %127 = vector.broadcast %cst_51 : f32 to vector<16x1xf32>
    %128 = arith.divf %126, %127 : vector<16x1xf32>
    %129 = vector.broadcast %128 : vector<16x1xf32> to vector<16x32xf32>
    %130 = arith.subf %120, %129 : vector<16x32xf32>
    %131 = arith.mulf %130, %130 : vector<16x32xf32>
    %cst_52 = arith.constant dense<0.000000e+00> : vector<16xf32>
    %132 = vector.multi_reduction <add>, %131, %cst_52 [1] : vector<16x32xf32> to vector<16xf32>
    %133 = vector.shape_cast %132 : vector<16xf32> to vector<16x1xf32>
    %cst_53 = arith.constant 3.200000e+01 : f32
    %134 = vector.broadcast %cst_53 : f32 to vector<16x1xf32>
    %135 = arith.divf %133, %134 : vector<16x1xf32>
    %cst_54 = arith.constant 9.99999996E-13 : f32
    %136 = vector.broadcast %cst_54 : f32 to vector<16x1xf32>
    %137 = arith.addf %135, %136 : vector<16x1xf32>
    %138 = math.rsqrt %137 : vector<16x1xf32>
    %139 = vector.broadcast %138 : vector<16x1xf32> to vector<16x32xf32>
    %140 = arith.mulf %130, %139 : vector<16x32xf32>
    %141 = vector.broadcast %122 : vector<1x32xf32> to vector<16x32xf32>
    %142 = arith.mulf %140, %141 : vector<16x32xf32>
    %143 = vector.broadcast %124 : vector<1x32xf32> to vector<16x32xf32>
    %144 = arith.addf %142, %143 : vector<16x32xf32>
    %145 = arith.truncf %144 : vector<16x32xf32> to vector<16x32xbf16>
    %c0_55 = arith.constant 0 : index
    %c0_56 = arith.constant 0 : index
    %c0_57 = arith.constant 0 : index
    %146 = vector.load %arg11[%c0_55, %c0_56, %c0_57] : memref<1x32x64xbf16, #tpu.memory_space<vmem>>, vector<1x32x64xbf16>
    %147 = vector.shape_cast %146 : vector<1x32x64xbf16> to vector<32x64xbf16>
    %cst_58 = arith.constant dense<0.000000e+00> : vector<16x64xf32>
    %148 = tpu.matmul %145, %147, %cst_58 {dimension_numbers = #tpu.dot_dimension_numbers<[1], [0], [0], [1], [0, 0, 1, 1], [], []>} : vector<16x32xbf16>, vector<32x64xbf16>, vector<16x64xf32> -> vector<16x64xf32>
    %c0_59 = arith.constant 0 : index
    %c0_60 = arith.constant 0 : index
    %c0_61 = arith.constant 0 : index
    %149 = vector.load %arg12[%c0_59, %c0_60, %c0_61] : memref<1x1x64xf32, #tpu.memory_space<vmem>>, vector<1x1x64xf32>
    %150 = vector.shape_cast %149 : vector<1x1x64xf32> to vector<1x64xf32>
    %151 = vector.broadcast %150 : vector<1x64xf32> to vector<16x64xf32>
    %152 = arith.addf %148, %151 : vector<16x64xf32>
    %153 = arith.mulf %152, %152 : vector<16x64xf32>
    %154 = arith.mulf %152, %153 : vector<16x64xf32>
    %cst_62 = arith.constant 4.471500e-02 : f32
    %155 = vector.broadcast %cst_62 : f32 to vector<16x64xf32>
    %156 = arith.mulf %155, %154 : vector<16x64xf32>
    %157 = arith.addf %152, %156 : vector<16x64xf32>
    %cst_63 = arith.constant 0.797884583 : f32
    %158 = vector.broadcast %cst_63 : f32 to vector<16x64xf32>
    %159 = arith.mulf %158, %157 : vector<16x64xf32>
    %160 = math.tanh %159 : vector<16x64xf32>
    %cst_64 = arith.constant 1.000000e+00 : f32
    %161 = vector.broadcast %cst_64 : f32 to vector<16x64xf32>
    %162 = arith.addf %161, %160 : vector<16x64xf32>
    %cst_65 = arith.constant 5.000000e-01 : f32
    %163 = vector.broadcast %cst_65 : f32 to vector<16x64xf32>
    %164 = arith.mulf %163, %162 : vector<16x64xf32>
    %165 = arith.mulf %152, %164 : vector<16x64xf32>
    %166 = arith.truncf %165 : vector<16x64xf32> to vector<16x64xbf16>
    %c0_66 = arith.constant 0 : index
    %c0_67 = arith.constant 0 : index
    %c0_68 = arith.constant 0 : index
    %167 = vector.load %arg13[%c0_66, %c0_67, %c0_68] : memref<1x64x32xbf16, #tpu.memory_space<vmem>>, vector<1x64x32xbf16>
    %168 = vector.shape_cast %167 : vector<1x64x32xbf16> to vector<64x32xbf16>
    %cst_69 = arith.constant dense<0.000000e+00> : vector<16x32xf32>
    %169 = tpu.matmul %166, %168, %cst_69 {dimension_numbers = #tpu.dot_dimension_numbers<[1], [0], [0], [1], [0, 0, 1, 1], [], []>} : vector<16x64xbf16>, vector<64x32xbf16>, vector<16x32xf32> -> vector<16x32xf32>
    %c0_70 = arith.constant 0 : index
    %c0_71 = arith.constant 0 : index
    %c0_72 = arith.constant 0 : index
    %170 = vector.load %arg14[%c0_70, %c0_71, %c0_72] : memref<1x1x32xf32, #tpu.memory_space<vmem>>, vector<1x1x32xf32>
    %171 = vector.shape_cast %170 : vector<1x1x32xf32> to vector<1x32xf32>
    %172 = vector.broadcast %171 : vector<1x32xf32> to vector<16x32xf32>
    %173 = arith.addf %169, %172 : vector<16x32xf32>
    %174 = arith.addf %144, %173 : vector<16x32xf32>
    %c0_73 = arith.constant 0 : index
    %c0_74 = arith.constant 0 : index
    %c0_75 = arith.constant 0 : index
    %175 = vector.load %arg15[%c0_73, %c0_74, %c0_75] : memref<1x1x32xf32, #tpu.memory_space<vmem>>, vector<1x1x32xf32>
    %176 = vector.shape_cast %175 : vector<1x1x32xf32> to vector<1x32xf32>
    %c0_76 = arith.constant 0 : index
    %c0_77 = arith.constant 0 : index
    %c0_78 = arith.constant 0 : index
    %177 = vector.load %arg16[%c0_76, %c0_77, %c0_78] : memref<1x1x32xf32, #tpu.memory_space<vmem>>, vector<1x1x32xf32>
    %178 = vector.shape_cast %177 : vector<1x1x32xf32> to vector<1x32xf32>
    %cst_79 = arith.constant dense<0.000000e+00> : vector<16xf32>
    %179 = vector.multi_reduction <add>, %174, %cst_79 [1] : vector<16x32xf32> to vector<16xf32>
    %180 = vector.shape_cast %179 : vector<16xf32> to vector<16x1xf32>
    %cst_80 = arith.constant 3.200000e+01 : f32
    %181 = vector.broadcast %cst_80 : f32 to vector<16x1xf32>
    %182 = arith.divf %180, %181 : vector<16x1xf32>
    %183 = vector.broadcast %182 : vector<16x1xf32> to vector<16x32xf32>
    %184 = arith.subf %174, %183 : vector<16x32xf32>
    %185 = arith.mulf %184, %184 : vector<16x32xf32>
    %cst_81 = arith.constant dense<0.000000e+00> : vector<16xf32>
    %186 = vector.multi_reduction <add>, %185, %cst_81 [1] : vector<16x32xf32> to vector<16xf32>
    %187 = vector.shape_cast %186 : vector<16xf32> to vector<16x1xf32>
    %cst_82 = arith.constant 3.200000e+01 : f32
    %188 = vector.broadcast %cst_82 : f32 to vector<16x1xf32>
    %189 = arith.divf %187, %188 : vector<16x1xf32>
    %cst_83 = arith.constant 9.99999996E-13 : f32
    %190 = vector.broadcast %cst_83 : f32 to vector<16x1xf32>
    %191 = arith.addf %189, %190 : vector<16x1xf32>
    %192 = math.rsqrt %191 : vector<16x1xf32>
    %193 = vector.broadcast %192 : vector<16x1xf32> to vector<16x32xf32>
    %194 = arith.mulf %184, %193 : vector<16x32xf32>
    %195 = vector.broadcast %176 : vector<1x32xf32> to vector<16x32xf32>
    %196 = arith.mulf %194, %195 : vector<16x32xf32>
    %197 = vector.broadcast %178 : vector<1x32xf32> to vector<16x32xf32>
    %198 = arith.addf %196, %197 : vector<16x32xf32>
    %c0_84 = arith.constant 0 : index
    %c0_85 = arith.constant 0 : index
    %199 = vector.load %arg22[%c0_84, %c0_85] : memref<16x32xf32, #tpu.memory_space<vmem>>, vector<16x32xf32>
    tpu.vector_store %arg22[%c0_84, %c0_85], %198 {strides = array<i32>} : memref<16x32xf32, #tpu.memory_space<vmem>>, vector<16x32xf32>,
    %c1_i32 = arith.constant 1 : i32
    %200 = arith.cmpi eq, %arg0, %c1_i32 : i32
    %201 = arith.extui %200 : i1 to i32
    %c0_i32_86 = arith.constant 0 : i32
    %202 = arith.cmpi ne, %201, %c0_i32_86 : i32
    scf.if %202 {
      %203 = vector.shape_cast %198 : vector<16x32xf32> to vector<2x8x32xf32>
      %204 = vector.extract_strided_slice %203 {offsets = [0, 0, 0], sizes = [2, 1, 32], strides = [1, 1, 1]} : vector<2x8x32xf32> to vector<2x1x32xf32>
      %205 = vector.shape_cast %204 : vector<2x1x32xf32> to vector<2x32xf32>
      %206 = arith.truncf %205 : vector<2x32xf32> to vector<2x32xbf16>
      %c0_87 = arith.constant 0 : index
      %c0_88 = arith.constant 0 : index
      %207 = vector.load %arg17[%c0_87, %c0_88] : memref<32x32xbf16, #tpu.memory_space<vmem>>, vector<32x32xbf16>
      %cst_89 = arith.constant dense<0.000000e+00> : vector<2x32xf32>
      %208 = tpu.matmul %206, %207, %cst_89 {dimension_numbers = #tpu.dot_dimension_numbers<[1], [0], [0], [1], [0, 0, 1, 1], [], []>} : vector<2x32xbf16>, vector<32x32xbf16>, vector<2x32xf32> -> vector<2x32xf32>
      %c0_90 = arith.constant 0 : index
      %c0_91 = arith.constant 0 : index
      %209 = vector.load %arg18[%c0_90, %c0_91] : memref<1x32xf32, #tpu.memory_space<vmem>>, vector<1x32xf32>
      %210 = vector.broadcast %209 : vector<1x32xf32> to vector<2x32xf32>
      %211 = arith.addf %208, %210 : vector<2x32xf32>
      %212 = math.tanh %211 : vector<2x32xf32>
      %c0_92 = arith.constant 0 : index
      %c0_93 = arith.constant 0 : index
      %213 = vector.load %arg19[%c0_92, %c0_93] : memref<1x32xf32, #tpu.memory_space<vmem>>, vector<1x32xf32>
      %214 = vector.broadcast %213 : vector<1x32xf32> to vector<2x32xf32>
      %215 = arith.mulf %212, %214 : vector<2x32xf32>
      %cst_94 = arith.constant dense<0.000000e+00> : vector<2xf32>
      %216 = vector.multi_reduction <add>, %215, %cst_94 [1] : vector<2x32xf32> to vector<2xf32>
      %217 = vector.shape_cast %216 : vector<2xf32> to vector<2x1xf32>
      %c0_95 = arith.constant 0 : index
      %c0_96 = arith.constant 0 : index
      %218 = vector.load %arg20[%c0_95, %c0_96] : memref<1x1xf32, #tpu.memory_space<vmem>>, vector<1x1xf32>
      %219 = vector.broadcast %218 : vector<1x1xf32> to vector<2x1xf32>
      %220 = arith.addf %217, %219 : vector<2x1xf32>
      %221 = arith.negf %220 : vector<2x1xf32>
      %222 = math.exp %221 : vector<2x1xf32>
      %cst_97 = arith.constant 1.000000e+00 : f32
      %223 = vector.broadcast %cst_97 : f32 to vector<2x1xf32>
      %224 = arith.addf %223, %222 : vector<2x1xf32>
      %225 = arith.divf %223, %224 : vector<2x1xf32>
      %c0_98 = arith.constant 0 : index
      %c0_99 = arith.constant 0 : index
      %226 = vector.load %arg21[%c0_98, %c0_99] : memref<2x1xf32, #tpu.memory_space<vmem>>, vector<2x1xf32>
      tpu.vector_store %arg21[%c0_98, %c0_99], %225 {strides = array<i32>} : memref<2x1xf32, #tpu.memory_space<vmem>>, vector<2x1xf32>,
    } else {
    }
    return
  }
  func.func @transform_0(%arg0: i32) -> (i32, i32, i32) {
    %c0_i32 = arith.constant 0 : i32
    %c0_i32_0 = arith.constant 0 : i32
    %c0_i32_1 = arith.constant 0 : i32
    %c0_i32_2 = arith.constant 0 : i32
    return %c0_i32, %c0_i32_0, %c0_i32_1 : i32, i32, i32
  }
  func.func @transform_1(%arg0: i32) -> (i32, i32) {
    %c0_i32 = arith.constant 0 : i32
    %c0_i32_0 = arith.constant 0 : i32
    %c0_i32_1 = arith.constant 0 : i32
    return %c0_i32, %c0_i32_0 : i32, i32
  }
  func.func @transform_2(%arg0: i32) -> (i32, i32) {
    %c0_i32 = arith.constant 0 : i32
    %c0_i32_0 = arith.constant 0 : i32
    %c0_i32_1 = arith.constant 0 : i32
    return %c0_i32, %c0_i32_0 : i32, i32
  }
  func.func @transform_3(%arg0: i32) -> (i32, i32) {
    %c0_i32 = arith.constant 0 : i32
    %c0_i32_0 = arith.constant 0 : i32
    %c0_i32_1 = arith.constant 0 : i32
    return %c0_i32, %c0_i32_0 : i32, i32
  }
  func.func @transform_4(%arg0: i32) -> (i32, i32, i32) {
    %c0_i32 = arith.constant 0 : i32
    %c0_i32_0 = arith.constant 0 : i32
    %c0_i32_1 = arith.constant 0 : i32
    return %arg0, %c0_i32, %c0_i32_0 : i32, i32, i32
  }
  func.func @transform_5(%arg0: i32) -> (i32, i32, i32) {
    %c0_i32 = arith.constant 0 : i32
    %c0_i32_0 = arith.constant 0 : i32
    %c0_i32_1 = arith.constant 0 : i32
    return %arg0, %c0_i32, %c0_i32_0 : i32, i32, i32
  }
  func.func @transform_6(%arg0: i32) -> (i32, i32, i32) {
    %c0_i32 = arith.constant 0 : i32
    %c0_i32_0 = arith.constant 0 : i32
    %c0_i32_1 = arith.constant 0 : i32
    return %arg0, %c0_i32, %c0_i32_0 : i32, i32, i32
  }
  func.func @transform_7(%arg0: i32) -> (i32, i32, i32) {
    %c0_i32 = arith.constant 0 : i32
    %c0_i32_0 = arith.constant 0 : i32
    %c0_i32_1 = arith.constant 0 : i32
    return %arg0, %c0_i32, %c0_i32_0 : i32, i32, i32
  }
  func.func @transform_8(%arg0: i32) -> (i32, i32, i32) {
    %c0_i32 = arith.constant 0 : i32
    %c0_i32_0 = arith.constant 0 : i32
    %c0_i32_1 = arith.constant 0 : i32
    return %arg0, %c0_i32, %c0_i32_0 : i32, i32, i32
  }
  func.func @transform_9(%arg0: i32) -> (i32, i32, i32) {
    %c0_i32 = arith.constant 0 : i32
    %c0_i32_0 = arith.constant 0 : i32
    %c0_i32_1 = arith.constant 0 : i32
    return %arg0, %c0_i32, %c0_i32_0 : i32, i32, i32
  }
  func.func @transform_10(%arg0: i32) -> (i32, i32, i32) {
    %c0_i32 = arith.constant 0 : i32
    %c0_i32_0 = arith.constant 0 : i32
    %c0_i32_1 = arith.constant 0 : i32
    return %arg0, %c0_i32, %c0_i32_0 : i32, i32, i32
  }
  func.func @transform_11(%arg0: i32) -> (i32, i32, i32) {
    %c0_i32 = arith.constant 0 : i32
    %c0_i32_0 = arith.constant 0 : i32
    %c0_i32_1 = arith.constant 0 : i32
    return %arg0, %c0_i32, %c0_i32_0 : i32, i32, i32
  }
  func.func @transform_12(%arg0: i32) -> (i32, i32, i32) {
    %c0_i32 = arith.constant 0 : i32
    %c0_i32_0 = arith.constant 0 : i32
    %c0_i32_1 = arith.constant 0 : i32
    return %arg0, %c0_i32, %c0_i32_0 : i32, i32, i32
  }
  func.func @transform_13(%arg0: i32) -> (i32, i32, i32) {
    %c0_i32 = arith.constant 0 : i32
    %c0_i32_0 = arith.constant 0 : i32
    %c0_i32_1 = arith.constant 0 : i32
    return %arg0, %c0_i32, %c0_i32_0 : i32, i32, i32
  }
  func.func @transform_14(%arg0: i32) -> (i32, i32, i32) {
    %c0_i32 = arith.constant 0 : i32
    %c0_i32_0 = arith.constant 0 : i32
    %c0_i32_1 = arith.constant 0 : i32
    return %arg0, %c0_i32, %c0_i32_0 : i32, i32, i32
  }
  func.func @transform_15(%arg0: i32) -> (i32, i32, i32) {
    %c0_i32 = arith.constant 0 : i32
    %c0_i32_0 = arith.constant 0 : i32
    %c0_i32_1 = arith.constant 0 : i32
    return %arg0, %c0_i32, %c0_i32_0 : i32, i32, i32
  }
  func.func @transform_16(%arg0: i32) -> (i32, i32) {
    %c0_i32 = arith.constant 0 : i32
    %c0_i32_0 = arith.constant 0 : i32
    %c0_i32_1 = arith.constant 0 : i32
    return %c0_i32, %c0_i32_0 : i32, i32
  }
  func.func @transform_17(%arg0: i32) -> (i32, i32) {
    %c0_i32 = arith.constant 0 : i32
    %c0_i32_0 = arith.constant 0 : i32
    %c0_i32_1 = arith.constant 0 : i32
    return %c0_i32, %c0_i32_0 : i32, i32
  }
  func.func @transform_18(%arg0: i32) -> (i32, i32) {
    %c0_i32 = arith.constant 0 : i32
    %c0_i32_0 = arith.constant 0 : i32
    %c0_i32_1 = arith.constant 0 : i32
    return %c0_i32, %c0_i32_0 : i32, i32
  }
  func.func @transform_19(%arg0: i32) -> (i32, i32) {
    %c0_i32 = arith.constant 0 : i32
    %c0_i32_0 = arith.constant 0 : i32
    %c0_i32_1 = arith.constant 0 : i32
    return %c0_i32, %c0_i32_0 : i32, i32
  }
  func.func @transform_20(%arg0: i32) -> (i32, i32) {
    %c0_i32 = arith.constant 0 : i32
    %c0_i32_0 = arith.constant 0 : i32
    %c0_i32_1 = arith.constant 0 : i32
    return %c0_i32, %c0_i32_0 : i32, i32
  }
}

</mosaic_0001>

<bundles_post_ra>
// kernel: hr_bert_forward.1
= control target key start
LH: loop header
LB: loop body
LE: loop exit
PB: predicated region body
PF: predicated region fallthrough
CT: control target
= control target key end

     0   :  { %s2948_s23 = smov 0   ;;  %s3295_s0 = inlined_call_operand.vmem [shape: f32[2,8,32], index: 0, kind: input, shape index: {}]   ;;  %s3296_s1 = inlined_call_operand.vmem [shape: f32[2,8], index: 1, kind: input, shape index: {}]   ;;  %s3297_s2 = inlined_call_operand.vmem [shape: f32[1,32], index: 2, kind: input, shape index: {}]   ;;  %s3298_s3 = inlined_call_operand.vmem [shape: f32[1,32], index: 3, kind: input, shape index: {}]   ;;  %s3299_s4 = inlined_call_operand.vmem [shape: bf16[2,32,96], index: 4, kind: input, shape index: {}]   ;;  %s3300_s5 = inlined_call_operand.vmem [shape: f32[2,1,96], index: 5, kind: input, shape index: {}]   ;;  %s3301_s6 = inlined_call_operand.vmem [shape: bf16[2,32,32], index: 6, kind: input, shape index: {}]   ;;  %s3302_s7 = inlined_call_operand.vmem [shape: f32[2,1,32], index: 7, kind: input, shape index: {}]   ;;  %s3303_s8 = inlined_call_operand.vmem [shape: f32[2,1,32], index: 8, kind: input, shape index: {}]   ;;  %s3304_s9 = inlined_call_operand.vmem [shape: f32[2,1,32], index: 9, kind: input, shape index: {}]   ;;  %s3305_s10 = inlined_call_operand.vmem [shape: bf16[2,32,64], index: 10, kind: input, shape index: {}]   ;;  %s3306_s11 = inlined_call_operand.vmem [shape: f32[2,1,64], index: 11, kind: input, shape index: {}]   ;;  %s3307_s12 = inlined_call_operand.vmem [shape: bf16[2,64,32], index: 12, kind: input, shape index: {}]   ;;  %s3308_s13 = inlined_call_operand.vmem [shape: f32[2,1,32], index: 13, kind: input, shape index: {}]   ;;  %s3309_s14 = inlined_call_operand.vmem [shape: f32[2,1,32], index: 14, kind: input, shape index: {}]   ;;  %s3310_s15 = inlined_call_operand.vmem [shape: f32[2,1,32], index: 15, kind: input, shape index: {}]   ;;  %s3311_s16 = inlined_call_operand.vmem [shape: bf16[32,32], index: 16, kind: input, shape index: {}]   ;;  %s3312_s17 = inlined_call_operand.vmem [shape: f32[1,32], index: 17, kind: input, shape index: {}]   ;;  %s3313_s18 = inlined_call_operand.vmem [shape: f32[1,32], index: 18, kind: input, shape index: {}]   ;;  %s3314_s19 = inlined_call_operand.<no memory space> [shape: f32[1,1], index: 19, kind: input, shape index: {}]   ;;  %s3315_s20 = inlined_call_operand.vmem [shape: f32[2,1], index: 20, kind: output, shape index: {}]  }
   0x1   :  { %3319 = sst [smem:[#allocation6_spill]] %s3295_s0  ;;  %v25_v0 = vstv %s3314_s19 }
   0x2   :  { %3320 = sst [smem:[#allocation7_spill]] %s3296_s1  ;;  %26 = vst [vmem:[#allocation4] sm:$0x1] %v25_v0 }
   0x3   :  { %3321 = sst [smem:[#allocation8_spill]] %s3297_s2 }
   0x4   :  { %3322 = sst [smem:[#allocation9_spill]] %s3298_s3 }
   0x5   :  { %3323 = sst [smem:[#allocation10_spill]] %s3299_s4 }
   0x6   :  { %3324 = sst [smem:[#allocation11_spill]] %s3301_s6 }
   0x7   :  { %3325 = sst [smem:[#allocation12_spill]] %s3311_s16 }
   0x8   :  { %3326 = sst [smem:[#allocation13_spill]] %s3312_s17 }
   0x9   :  { %3327 = sst [smem:[#allocation14_spill]] %s3313_s18 }
   0xa   :  { %3328 = sst [smem:[#allocation15_spill]] %s3315_s20 }
   0xb LB: > { %3329 = sst [smem:[#allocation5_spill]] %s2819_s23  ;;  %s2954_s24 = sadd.s32 4294967295, %s2819_s23   ;;  %s2819_s23 = sphi %s2948_s23, %s32_s23  }
   0xc   : > { %p2466_p0 = scmp.ge.s32.totalorder %s2819_s23, 1  ;;  %p653_p1 = scmp.lt.s32.totalorder %s2819_s23, 3 }
   0xe   : > { %p654_p2 = pnand %p2466_p0, %p653_p1 }
   0xf   : > { %p745_p3 = scmp.lt.s32.totalorder (!%p654_p2), %s2954_s24, 1  ;;  %s3330_s4 = sld [smem:[#allocation10_spill]] (!%p654_p2) }
  0x10   : > { %657 = sbr.rel (%p654_p2) target bundleno = 4909 (0x132d), region = 100  ;;  %s3331_s6 = sld [smem:[#allocation11_spill]] (!%p654_p2) }
  0x11   : > { %p2475_p4 = scmp.ne.s32.totalorder (!%p654_p2), %s2954_s24, 0 }
  0x17   : > { %s2960_s19 = scalar_select %p745_p3, %s2954_s24, 1 }
  0x18   : > { %793 = sbr.rel (%p2475_p4) target bundleno = 349 (0x15d), region = 104  ;;  %s3332_s1 = sld [smem:[#allocation6_spill]] (!%p2475_p4)  ;;  %vm798_vm0 = vcmask (!%p2475_p4), 261120  }
  0x19   : > { %s2527_s2 = sshll.u32 %s2960_s19, 4  ;;  %s2530_s16 = sshll.u32 %s2960_s19, 5 }
  0x1a   : > { %s2970_s29 = scalar_lea.vmem %s3330_s4, %s2527_s2  ;;  %s2975_s21 = scalar_lea.vmem %s3331_s6, %s2527_s2 }
  0x1b   : > { %s2992_s4 = scalar_lea.vmem %s3305_s10, %s2527_s2  ;;  %s774_s6 = scalar_lea.vmem %s3306_s11, %s2960_s19 }
  0x1c   : > { %s3002_s23 = scalar_lea.vmem %s3307_s12, %s2530_s16  ;;  %s782_s25 = scalar_lea.vmem %s3308_s13, %s2960_s19 }
  0x1d   : > { %s785_s27 = scalar_lea.vmem %s3309_s14, %s2960_s19  ;;  %s788_s17 = scalar_lea.vmem %s3310_s15, %s2960_s19 }
  0x1e   : > { %v794_v1 = vld [vmem:[%s3332_s1] sm:$0xff] (!%p2475_p4)  ;;  %v795_v2 = vld [vmem:[%s3332_s1 + $0x8] sm:$0xff] (!%p2475_p4)  ;;  %s3333_s20 = sld [smem:[#allocation8_spill]] (!%p2475_p4)  ;;  %s3334_s28 = sld [smem:[#allocation9_spill]] (!%p2475_p4) }
  0x1f   : > { %v799_v3 = vsel %vm798_vm0, %v794_v1, 0.0  ;;  %v802_v4 = vsel %vm798_vm0, %v795_v2, 0.0 }
  0x20   : > { %800 = vadd.xlane.f32.xlu0 %v799_v3 }
  0x24   : > { %803 = vadd.xlane.f32.xlu0 %v802_v4  ;;  %v2476_v22 = vld [vmem:[%s3333_s20] ss:$0 sm:$0xff] }
  0x25   : > { %v2477_v24 = vld [vmem:[%s3334_s28] ss:$0 sm:$0xff] }
  0xad   : > { %v801_v5 = vpop.xlane.xlu0 %800 }
  0xae   : > { %v806_v6 = vmul.f32 0.03125, %v801_v5 }
  0xb0   : > { %v808_v7 = vsub.f32 %v794_v1, %v806_v6 }
  0xb1   : > { %v804_v8 = vpop.xlane.xlu0 %803 }
  0xb2   : > { %v807_v9 = vmul.f32 0.03125, %v804_v8  ;;  %v810_v10 = vmul.f32 %v808_v7, %v808_v7 }
  0xb4   : > { %v809_v11 = vsub.f32 %v795_v2, %v807_v9  ;;  %v812_v12 = vsel %vm798_vm0, %v810_v10, 0.0 }
  0xb5   : > { %813 = vadd.xlane.f32.xlu1 %v812_v12 }
  0xb6   : > { %v811_v13 = vmul.f32 %v809_v11, %v809_v11 }
  0xb8   : > { %v815_v14 = vsel %vm798_vm0, %v811_v13, 0.0 }
  0xb9   : > { %816 = vadd.xlane.f32.xlu1 %v815_v14 }
 0x142   : > { %v814_v15 = vpop.xlane.xlu1 %813 }
 0x143   : > { %v818_v16 = vmul.f32 0.03125, %v814_v15 }
 0x145   : > { %v820_v17 = vadd.f32 1e-12, %v818_v16 }
 0x146   : > { %v817_v18 = vpop.xlane.xlu1 %816 }
 0x147   : > { %2747 = vrsqrt.f32 %v820_v17  ;;  %v819_v19 = vmul.f32 0.03125, %v817_v18 }
 0x149   : > { %v821_v20 = vadd.f32 1e-12, %v819_v19 }
 0x14b   : > { %2749 = vrsqrt.f32 %v821_v20 }
 0x151   : > { %v2748_v21 = vpop.eup %2747 }
 0x152   : > { %v824_v23 = vmul.f32 %v2748_v21, %v808_v7 }
 0x154   : > { %v832_v25 = vmul.f32 %v2476_v22, %v824_v23 }
 0x155   : > { %v2750_v26 = vpop.eup %2749 }
 0x156   : > { %v840_v27 = vadd.f32 %v2477_v24, %v832_v25  ;;  %v825_v28 = vmul.f32 %v2750_v26, %v809_v11 }
 0x158   : > { %842 = vst.msk [vmem:[#allocation2] sm:$0xff] %vm798_vm0, %v840_v27  ;;  %v833_v29 = vmul.f32 %v2476_v22, %v825_v28 }
 0x15a   : > { %v841_v30 = vadd.f32 %v2477_v24, %v833_v29 }
 0x15c   : > { %843 = vst.msk [vmem:[#allocation2 + $0x8] sm:$0xff] %vm798_vm0, %v841_v30 }
 0x15d PF: > { %v2751_v31 = vld [vmem:[%s2970_s29] sm:$0xff]   ;;  %v2821_v32 = vmov 0.0   ;;  %v2752_v33 = vld [vmem:[%s2970_s29 + $0x8] sm:$0xff]   ;;  %vm2822_vm1 = vmmov 0   ;;  %vm870_vm2 = vcmask 261120   ;;  %s3335_s0 = scalar_lea.vmem %s3300_s5, %s2960_s19  ;;  %s2823_s16 = smov 96   ;;  %v930_v52 = vlaneseq }
 0x15e   : > { %2580 = vmatprep.subr.bf16.mxu0 %v2821_v32  ;;  %2588 = vmatprep.subr.bf16.mxu1 %v2821_v32  ;;  %v2478_v37 = vld [vmem:[%s3335_s0] ss:$0 sm:$0xff]  ;;  %vm944_vm3 = vcmask 64512   ;;  %v2824_v50 = vmov 1966171168   ;;  %s3336_s18 = sld [smem:[#allocation7_spill]] }
 0x15f   : > { %2581 = vmatpush3.bf16.msra.mxu0 %v2751_v31  ;;  %2584 = vmatprep.mubr.msk.bf16.mxu0 %vm2822_vm1, %v2821_v32  ;;  %v3041_v34 = vld [vmem:[#allocation2] sm:$0xff]  ;;  %v928_v51 = vunpack.c.l.s4 %v2824_v50  ;;  %v931_v54 = vshrl.u32 %v930_v52, 7  ;;  %s2825_s20 = smov 64   ;;  %s2826_s3 = smov 88   ;;  %vm1083_vm4 = vcmask 1043456   ;;  %vm1409_vm5 = vcmask 130112  }
 0x160   : > { %2582 = vmatprep.subr.bf16.mxu0 %v2821_v32  ;;  %2590 = vmatprep.mubr.msk.bf16.mxu1 %vm2822_vm1, %v2821_v32  ;;  %s2827_s2 = smov 120   ;;  %s2828_s28 = smov 56   ;;  %vm1644_vm6 = vcmask 195712   ;;  %vm1879_vm7 = vcmask 261312   ;;  %vm2125_vm8 = vcmask 523264  }
 0x161   : > { %v929_v53 = vunpack.c.0.s8 %v928_v51  ;;  %v1044_v59 = vsub.s32 0, %v931_v54  ;;  %s2829_s29 = smov 80   ;;  %s2830_s30 = smov 112  }
 0x162   : > { %s2831_s0 = smov 48   ;;  %s2833_s22 = smov 104  }
 0x163   : > { %v3043_v35 = vld [vmem:[#allocation2 + $0x8] sm:$0xff]  ;;  %2583 = vmatpush3.bf16.msra.mxu0 %v2752_v33  ;;  %v932_v55 = vsub.s32 %v929_v53, %v931_v54  ;;  %s2834_s26 = smov 40   ;;  %p2517_p5 = scmp.ne.s32.totalorder %s2954_s24, 1 }
 0x164   : > { %v846_v36 = vpack.c.bf16 %v3043_v35, %v3041_v34  ;;  %2594 = vmatprep.subr.bf16.mxu0 %v2821_v32  ;;  %v2482_v56 = vld.sshfl [vmem:[%s3336_s18] sm:$0x11 pattern:$0x75316420]  ;;  %s2835_s18 = smov 8   ;;  %vm2839_vm9 = vmmov (!%p2517_p5), 0  }
 0x165   : > { %v926_v57 = vcombine.high %v2482_v56, %v2482_v56  ;;  %v933_v58 = vrot.slane %v2482_v56, %v932_v55  ;;  %vm2240_vm10 = vcmask (!%p2517_p5), 1041409   ;;  %vm2307_vm11 = vcmask (!%p2517_p5), 254976  }
 0x166   : > { %2585 = vmatmul.mubr.msk.bf16.vlgmr.msra.gmra.mrb[0].mxu0 %vm870_vm2, %v846_v36  ;;  %vm2325_vm12 = vcmask (!%p2517_p5), 1024  }
 0x167   : > { %2596 = vmatprep.mubr.msk.bf16.mxu0 %vm2822_vm1, %v2821_v32  ;;  %v3080_v60 = vrot.slane %v933_v58, %v1044_v59  ;;  %v940_v61 = vrot.slane %v926_v57, %v932_v55 }
 0x169   : > { %v3083_v4 = vrot.slane %v940_v61, %v1044_v59 }
 0x239   : > { %v908_v38 = vpop.f32.mrb[0].mxu0 }
 0x23a   : > { %v909_v39 = vadd.f32 %v2478_v37, %v908_v38  ;;  %v2586_v40 = vpop.f32.mrb[1].mxu0 }
 0x23b   : > { %v911_v41 = vpop.f32.mrb[2].mxu0 }
 0x23c   : > { %v3059_v42 = vpack.c.bf16 %v909_v39, %v909_v39  ;;  %v912_v43 = vadd.f32 %v2478_v37, %v911_v41  ;;  %v2587_v44 = vpop.f32.mrb[3].mxu0 }
 0x23e   : > { %942 = vrot.lane.b32.xlu0 %v3059_v42, %s2823_s16  ;;  %v3062_v45 = vpack.c.bf16 %v912_v43, %v912_v43 }
 0x242   : > { %992 = vrot.lane.b32.xlu0 %v3062_v45, %s2823_s16  ;;  %s2832_s16 = smov 72  }
 0x2b0   : > { %v943_v46 = vpop.permute.xlu0 %942 }
 0x2b1   : > { %v949_v47 = vsel %vm944_vm3, %v943_v46, 0 }
 0x2b2   : > { %2589 = vmatpush3.bf16.xpose.msra.mxu1 %v949_v47 }
 0x2b3   : > { %2600 = vmatprep.subr.bf16.mxu1 %v2821_v32 }
 0x2b4   : > { %v993_v48 = vpop.permute.xlu0 %992 }
 0x2b5   : > { %v998_v49 = vsel %vm944_vm3, %v993_v48, 0 }
 0x2b6   : > { %2595 = vmatpush3.bf16.xpose.msra.mxu0 %v998_v49 }
 0x2b7   : > { %2606 = vmatprep.subr.bf16.mxu0 %v2821_v32 }
 0x2b9   : > { %2591 = vmatmul.mubr.msk.bf16.vlgmr.msra.gmra.mrb[0].mxu1 %vm944_vm3, %v3059_v42 }
 0x2ba   : > { %2602 = vmatprep.mubr.msk.bf16.mxu1 %vm2822_vm1, %v2821_v32 }
 0x2bd   : > { %2597 = vmatmul.mubr.msk.bf16.vlgmr.msra.gmra.mrb[4].mxu0 %vm944_vm3, %v3062_v45 }
 0x2be   : > { %2608 = vmatprep.mubr.msk.bf16.mxu0 %vm2822_vm1, %v2821_v32 }
 0x38c   : > { %v985_v62 = vpop.f32.mrb[0].mxu1 }
 0x38d   : > { %v1040_v63 = vmul.f32 0.35355338, %v985_v62  ;;  %v2592_v0 = vpop.f32.mrb[1].mxu1 }
 0x38e   : > { %v988_v1 = vpop.f32.mrb[2].mxu1 }
 0x38f   : > { %v2593_v2 = vpop.f32.mrb[3].mxu1  ;;  %v1052_v3 = vadd.f32 %v3080_v60, %v1040_v63 }
 0x390   : > { %v1034_v5 = vpop.f32.mrb[4].mxu0 }
 0x391   : > { %v1041_v6 = vmul.f32 0.35355338, %v1034_v5  ;;  %v2598_v7 = vpop.f32.mrb[5].mxu0  ;;  %v1054_v8 = vsel %vm944_vm3, %v1052_v3, -inf }
 0x392   : > { %1055 = vmax.xlane.f32.xlu1 %v1054_v8  ;;  %v1037_v9 = vpop.f32.mrb[6].mxu0 }
 0x393   : > { %v2599_v10 = vpop.f32.mrb[7].mxu0  ;;  %v1053_v11 = vadd.f32 %v3083_v4, %v1041_v6 }
 0x395   : > { %v1057_v12 = vsel %vm944_vm3, %v1053_v11, -inf }
 0x396   : > { %1058 = vmax.xlane.f32.xlu1 %v1057_v12 }
 0x3a7   : > { %1078 = vrot.lane.b32.xlu1 %v3059_v42, %s2825_s20 }
 0x3ab   : > { %1127 = vrot.lane.b32.xlu1 %v3062_v45, %s2825_s20  ;;  %s2836_s20 = smov 16  }
 0x3af   : > { %1179 = vrot.lane.b32.xlu1 %v3059_v42, %s2826_s3 }
 0x41f   : > { %v1056_v13 = vpop.xlane.xlu1 %1055 }
 0x420   : > { %v1060_v14 = vsub.f32 %v1052_v3, %v1056_v13 }
 0x422   : > { %v1062_v15 = vmul.f32 1.442695, %v1060_v14 }
 0x423   : > { %v1059_v16 = vpop.xlane.xlu1 %1058 }
 0x424   : > { %2761 = vpow2.f32 %v1062_v15  ;;  %v1061_v17 = vsub.f32 %v1053_v11, %v1059_v16 }
 0x426   : > { %v1064_v18 = vmul.f32 1.442695, %v1061_v17 }
 0x427   : > { %v1079_v19 = vpop.permute.xlu1 %1078 }
 0x428   : > { %2763 = vpow2.f32 %v1064_v18  ;;  %v1085_v20 = vsel %vm1083_vm4, %v1079_v19, 0 }
 0x429   : > { %2601 = vmatpush3.bf16.msra.mxu1 %v1085_v20 }
 0x42a   : > { %2612 = vmatprep.subr.bf16.mxu1 %v2821_v32 }
 0x42b   : > { %v1128_v21 = vpop.permute.xlu1 %1127 }
 0x42c   : > { %v1133_v22 = vsel %vm1083_vm4, %v1128_v21, 0 }
 0x42d   : > { %2607 = vmatpush3.bf16.msra.mxu0 %v1133_v22 }
 0x42e   : > { %v2762_v23 = vpop.eup %2761  ;;  %2618 = vmatprep.subr.bf16.mxu0 %v2821_v32 }
 0x42f   : > { %v1066_v24 = vsel %vm944_vm3, %v2762_v23, 0.0  ;;  %v1180_v27 = vpop.permute.xlu1 %1179 }
 0x430   : > { %1067 = vadd.xlane.f32.xlu0 %v1066_v24  ;;  %v1185_v37 = vsel %vm944_vm3, %v1180_v27, 0 }
 0x432   : > { %v2764_v25 = vpop.eup %2763 }
 0x433   : > { %v1069_v26 = vsel %vm944_vm3, %v2764_v25, 0.0 }
 0x434   : > { %1070 = vadd.xlane.f32.xlu1 %v1069_v26 }
 0x445   : > { %1229 = vrot.lane.b32.xlu1 %v3062_v45, %s2826_s3  ;;  %s2837_s3 = smov 24  }
 0x446   : > { %1177 = vrot.lane.b32.xlu0 %v3059_v42, %s2827_s2 }
 0x449   : > { %1227 = vrot.lane.b32.xlu1 %v3062_v45, %s2827_s2 }
 0x4bd   : > { %v1068_v28 = vpop.xlane.xlu0 %1067 }
 0x4be   : > { %2765 = vrcp.f32 %v1068_v28 }
 0x4c1   : > { %v1071_v29 = vpop.xlane.xlu1 %1070  ;;  %v1178_v43 = vpop.permute.xlu0 %1177 }
 0x4c2   : > { %2767 = vrcp.f32 %v1071_v29 }
 0x4c5   : > { %v1230_v39 = vpop.permute.xlu1 %1229 }
 0x4c6   : > { %v1235_v41 = vsel %vm944_vm3, %v1230_v39, 0 }
 0x4c8   : > { %v2766_v30 = vpop.eup %2765 }
 0x4c9   : > { %v1074_v31 = vmul.f32 %v2766_v30, %v2762_v23  ;;  %v1228_v44 = vpop.permute.xlu1 %1227 }
 0x4cb   : > { %v1076_v33 = vpack.c.bf16 %v1074_v31, %v1074_v31 }
 0x4cc   : > { %v2768_v36 = vpop.eup %2767 }
 0x4cd   : > { %v1075_v38 = vmul.f32 %v2768_v36, %v2764_v25  ;;  %2603 = vmatmul.mubr.msk.bf16.vlgmr.msra.gmra.mrb[4].mxu1 %vm944_vm3, %v1076_v33 }
 0x4ce   : > { %2613 = vmatpush3.bf16.xpose.msra.mxu1 %v1185_v37  ;;  %2614 = vmatprep.mubr.msk.bf16.mxu1 %vm2822_vm1, %v2821_v32 }
 0x4cf   : > { %v1077_v40 = vpack.c.bf16 %v1075_v38, %v1075_v38  ;;  %2624 = vmatprep.subr.bf16.mxu1 %v2821_v32 }
 0x4d1   : > { %2609 = vmatmul.mubr.msk.bf16.vlgmr.msra.gmra.mrb[8].mxu0 %vm944_vm3, %v1077_v40 }
 0x4d2   : > { %2619 = vmatpush3.bf16.xpose.msra.mxu0 %v1235_v41  ;;  %2620 = vmatprep.mubr.msk.bf16.mxu0 %vm2822_vm1, %v2821_v32 }
 0x4d3   : > { %2630 = vmatprep.subr.bf16.mxu0 %v2821_v32 }
 0x4d5   : > { %2615 = vmatmul.mubr.msk.bf16.vlgmr.msra.gmra.mrb[8].mxu1 %vm944_vm3, %v1178_v43 }
 0x4d6   : > { %2626 = vmatprep.mubr.msk.bf16.mxu1 %vm2822_vm1, %v2821_v32 }
 0x4d9   : > { %2621 = vmatmul.mubr.msk.bf16.vlgmr.msra.gmra.mrb[12].mxu0 %vm944_vm3, %v1228_v44 }
 0x4da   : > { %2632 = vmatprep.mubr.msk.bf16.mxu0 %vm2822_vm1, %v2821_v32 }
 0x5a0   : > { %v1121_v46 = vpop.f32.mrb[4].mxu1 }
 0x5a1   : > { %1175 = vst.msk [vmem:[#allocation3] sm:$0xff] %vm944_vm3, %v1121_v46  ;;  %v2604_v47 = vpop.f32.mrb[5].mxu1 }
 0x5a2   : > { %v1124_v48 = vpop.f32.mrb[6].mxu1 }
 0x5a3   : > { %v2605_v49 = vpop.f32.mrb[7].mxu1 }
 0x5a4   : > { %v1169_v50 = vpop.f32.mrb[8].mxu0 }
 0x5a5   : > { %1176 = vst.msk [vmem:[#allocation3 + $0x8] sm:$0xff] %vm944_vm3, %v1169_v50  ;;  %v2610_v51 = vpop.f32.mrb[9].mxu0 }
 0x5a6   : > { %v1172_v52 = vpop.f32.mrb[10].mxu0 }
 0x5a7   : > { %v2611_v53 = vpop.f32.mrb[11].mxu0 }
 0x5a8   : > { %v1221_v54 = vpop.f32.mrb[8].mxu1 }
 0x5a9   : > { %v1277_v55 = vmul.f32 0.35355338, %v1221_v54  ;;  %v2616_v56 = vpop.f32.mrb[9].mxu1 }
 0x5aa   : > { %v1224_v57 = vpop.f32.mrb[10].mxu1 }
 0x5ab   : > { %v2617_v58 = vpop.f32.mrb[11].mxu1  ;;  %v1279_v59 = vadd.f32 %v1277_v55, %v3080_v60 }
 0x5ac   : > { %v1271_v61 = vpop.f32.mrb[12].mxu0 }
 0x5ad   : > { %v1278_v62 = vmul.f32 0.35355338, %v1271_v61  ;;  %v2622_v63 = vpop.f32.mrb[13].mxu0  ;;  %v1281_v0 = vsel %vm944_vm3, %v1279_v59, -inf }
 0x5ae   : > { %1282 = vmax.xlane.f32.xlu1 %v1281_v0  ;;  %v1274_v1 = vpop.f32.mrb[14].mxu0 }
 0x5af   : > { %v2623_v2 = vpop.f32.mrb[15].mxu0  ;;  %v1280_v3 = vadd.f32 %v1278_v62, %v3083_v4 }
 0x5b1   : > { %v1284_v5 = vsel %vm944_vm3, %v1280_v3, -inf }
 0x5b2   : > { %1285 = vmax.xlane.f32.xlu0 %v1284_v5 }
 0x5bf   : > { %1305 = vrot.lane.b32.xlu1 %v3059_v42, %s2828_s28 }
 0x5c3   : > { %1414 = vrot.lane.b32.xlu1 %v3059_v42, %s2829_s29 }
 0x5c8   : > { %1353 = vrot.lane.b32.xlu0 %v3062_v45, %s2828_s28  ;;  %s3337_s28 = scalar_lea.vmem %s3302_s7, %s2960_s19 }
 0x5cc   : > { %1412 = vrot.lane.b32.xlu0 %v3059_v42, %s2830_s30 }
 0x63b   : > { %v1283_v6 = vpop.xlane.xlu1 %1282 }
 0x63c   : > { %v1287_v7 = vsub.f32 %v1279_v59, %v1283_v6 }
 0x63e   : > { %v1289_v8 = vmul.f32 1.442695, %v1287_v7 }
 0x63f   : > { %v1306_v9 = vpop.permute.xlu1 %1305  ;;  %v1286_v10 = vpop.xlane.xlu0 %1285 }
 0x640   : > { %2769 = vpow2.f32 %v1289_v8  ;;  %v1311_v11 = vsel %vm1083_vm4, %v1306_v9, 0  ;;  %v1288_v12 = vsub.f32 %v1280_v3, %v1286_v10 }
 0x641   : > { %2625 = vmatpush3.bf16.msra.mxu1 %v1311_v11 }
 0x642   : > { %v1291_v13 = vmul.f32 1.442695, %v1288_v12  ;;  %2636 = vmatprep.subr.bf16.mxu1 %v2821_v32 }
 0x643   : > { %v1354_v14 = vpop.permute.xlu0 %1353  ;;  %v1415_v20 = vpop.permute.xlu1 %1414 }
 0x644   : > { %2771 = vpow2.f32 %v1291_v13  ;;  %v1359_v15 = vsel %vm1083_vm4, %v1354_v14, 0  ;;  %v1420_v27 = vsel %vm944_vm3, %v1415_v20, 0 }
 0x645   : > { %2631 = vmatpush3.bf16.msra.mxu0 %v1359_v15 }
 0x646   : > { %2642 = vmatprep.subr.bf16.mxu0 %v2821_v32 }
 0x647   : > { %v1413_v33 = vpop.permute.xlu0 %1412 }
 0x64a   : > { %v2770_v16 = vpop.eup %2769 }
 0x64b   : > { %v1293_v17 = vsel %vm944_vm3, %v2770_v16, 0.0 }
 0x64c   : > { %1294 = vadd.xlane.f32.xlu1 %v1293_v17 }
 0x64e   : > { %v2772_v18 = vpop.eup %2771 }
 0x64f   : > { %v1296_v19 = vsel %vm944_vm3, %v2772_v18, 0.0 }
 0x650   : > { %1297 = vadd.xlane.f32.xlu1 %v1296_v19 }
 0x661   : > { %1464 = vrot.lane.b32.xlu1 %v3062_v45, %s2829_s29 }
 0x665   : > { %1462 = vrot.lane.b32.xlu1 %v3062_v45, %s2830_s30  ;;  %s3341_s30 = sld [smem:[#allocation13_spill]] (!%p2517_p5) }
 0x6d9   : > { %v1295_v21 = vpop.xlane.xlu1 %1294 }
 0x6da   : > { %2773 = vrcp.f32 %v1295_v21 }
 0x6dd   : > { %v1298_v22 = vpop.xlane.xlu1 %1297 }
 0x6de   : > { %2775 = vrcp.f32 %v1298_v22 }
 0x6e1   : > { %v1465_v29 = vpop.permute.xlu1 %1464 }
 0x6e2   : > { %v1470_v31 = vsel %vm944_vm3, %v1465_v29, 0 }
 0x6e4   : > { %v2774_v23 = vpop.eup %2773 }
 0x6e5   : > { %v1301_v24 = vmul.f32 %v2774_v23, %v2770_v16  ;;  %v1463_v36 = vpop.permute.xlu1 %1462 }
 0x6e7   : > { %v1303_v25 = vpack.c.bf16 %v1301_v24, %v1301_v24 }
 0x6e8   : > { %v2776_v26 = vpop.eup %2775 }
 0x6e9   : > { %v1302_v28 = vmul.f32 %v2776_v26, %v2772_v18  ;;  %2627 = vmatmul.mubr.msk.bf16.vlgmr.msra.gmra.mrb[12].mxu1 %vm944_vm3, %v1303_v25 }
 0x6ea   : > { %2637 = vmatpush3.bf16.xpose.msra.mxu1 %v1420_v27  ;;  %2638 = vmatprep.mubr.msk.bf16.mxu1 %vm2822_vm1, %v2821_v32 }
 0x6eb   : > { %v1304_v30 = vpack.c.bf16 %v1302_v28, %v1302_v28  ;;  %2648 = vmatprep.subr.bf16.mxu1 %v2821_v32 }
 0x6ed   : > { %2633 = vmatmul.mubr.msk.bf16.vlgmr.msra.gmra.mrb[16].mxu0 %vm944_vm3, %v1304_v30 }
 0x6ee   : > { %2643 = vmatpush3.bf16.xpose.msra.mxu0 %v1470_v31  ;;  %2644 = vmatprep.mubr.msk.bf16.mxu0 %vm2822_vm1, %v2821_v32 }
 0x6ef   : > { %2654 = vmatprep.subr.bf16.mxu0 %v2821_v32 }
 0x6f1   : > { %2639 = vmatmul.mubr.msk.bf16.vlgmr.msra.gmra.mrb[16].mxu1 %vm944_vm3, %v1413_v33 }
 0x6f2   : > { %2650 = vmatprep.mubr.msk.bf16.mxu1 %vm2822_vm1, %v2821_v32 }
 0x6f5   : > { %2645 = vmatmul.mubr.msk.bf16.vlgmr.msra.gmra.mrb[20].mxu0 %vm944_vm3, %v1463_v36 }
 0x6f6   : > { %2656 = vmatprep.mubr.msk.bf16.mxu0 %vm2822_vm1, %v2821_v32 }
 0x7bc   : > { %v3150_v37 = vpop.f32.mrb[12].mxu1 }
 0x7bd   : > { %v2628_v38 = vpop.f32.mrb[13].mxu1 }
 0x7be   : > { %v1350_v39 = vpop.f32.mrb[14].mxu1 }
 0x7bf   : > { %v2629_v40 = vpop.f32.mrb[15].mxu1 }
 0x7c0   : > { %v3152_v41 = vpop.f32.mrb[16].mxu0 }
 0x7c1   : > { %v2634_v43 = vpop.f32.mrb[17].mxu0 }
 0x7c2   : > { %v1398_v44 = vpop.f32.mrb[18].mxu0 }
 0x7c3   : > { %v2635_v46 = vpop.f32.mrb[19].mxu0 }
 0x7c4   : > { %v1456_v47 = vpop.f32.mrb[16].mxu1 }
 0x7c5   : > { %v1512_v48 = vmul.f32 0.35355338, %v1456_v47  ;;  %v2640_v49 = vpop.f32.mrb[17].mxu1 }
 0x7c6   : > { %v1459_v50 = vpop.f32.mrb[18].mxu1 }
 0x7c7   : > { %v2641_v51 = vpop.f32.mrb[19].mxu1  ;;  %v1514_v52 = vadd.f32 %v1512_v48, %v3080_v60 }
 0x7c8   : > { %v1506_v53 = vpop.f32.mrb[20].mxu0 }
 0x7c9   : > { %v1513_v54 = vmul.f32 0.35355338, %v1506_v53  ;;  %v2646_v55 = vpop.f32.mrb[21].mxu0  ;;  %v1516_v56 = vsel %vm944_vm3, %v1514_v52, -inf }
 0x7ca   : > { %1517 = vmax.xlane.f32.xlu0 %v1516_v56  ;;  %v1509_v57 = vpop.f32.mrb[22].mxu0 }
 0x7cb   : > { %v2647_v58 = vpop.f32.mrb[23].mxu0  ;;  %v1515_v59 = vadd.f32 %v1513_v54, %v3083_v4 }
 0x7cd   : > { %v1519_v61 = vsel %vm944_vm3, %v1515_v59, -inf }
 0x7ce   : > { %1520 = vmax.xlane.f32.xlu1 %v1519_v61 }
 0x7df   : > { %1540 = vrot.lane.b32.xlu1 %v3059_v42, %s2831_s0 }
 0x7e3   : > { %1649 = vrot.lane.b32.xlu1 %v3059_v42, %s2832_s16 }
 0x7e7   : > { %1699 = vrot.lane.b32.xlu1 %v3062_v45, %s2832_s16  ;;  %s3342_s16 = sld [smem:[#allocation14_spill]] (!%p2517_p5) }
 0x7eb   : > { %1697 = vrot.lane.b32.xlu1 %v3062_v45, %s2833_s22 }
 0x857   : > { %v1518_v62 = vpop.xlane.xlu0 %1517 }
 0x858   : > { %v1522_v63 = vsub.f32 %v1514_v52, %v1518_v62 }
 0x85a   : > { %v1524_v0 = vmul.f32 1.442695, %v1522_v63 }
 0x85b   : > { %v1521_v1 = vpop.xlane.xlu1 %1520 }
 0x85c   : > { %2777 = vpow2.f32 %v1524_v0  ;;  %v1523_v2 = vsub.f32 %v1515_v59, %v1521_v1 }
 0x85e   : > { %v1526_v3 = vmul.f32 1.442695, %v1523_v2 }
 0x85f   : > { %v1541_v5 = vpop.permute.xlu1 %1540 }
 0x860   : > { %2779 = vpow2.f32 %v1526_v3  ;;  %v1546_v6 = vsel %vm1083_vm4, %v1541_v5, 0 }
 0x861   : > { %2649 = vmatpush3.bf16.msra.mxu1 %v1546_v6 }
 0x862   : > { %2660 = vmatprep.subr.bf16.mxu1 %v2821_v32 }
 0x863   : > { %v1650_v16 = vpop.permute.xlu1 %1649 }
 0x864   : > { %v1655_v20 = vsel %vm944_vm3, %v1650_v16, 0 }
 0x866   : > { %v2778_v7 = vpop.eup %2777 }
 0x867   : > { %v1528_v8 = vsel %vm944_vm3, %v2778_v7, 0.0  ;;  %v1700_v22 = vpop.permute.xlu1 %1699 }
 0x868   : > { %1529 = vadd.xlane.f32.xlu0 %v1528_v8  ;;  %v1705_v24 = vsel %vm944_vm3, %v1700_v22, 0 }
 0x86a   : > { %v2780_v9 = vpop.eup %2779 }
 0x86b   : > { %v1531_v10 = vsel %vm944_vm3, %v2780_v9, 0.0  ;;  %v1698_v26 = vpop.permute.xlu1 %1697 }
 0x86c   : > { %1532 = vadd.xlane.f32.xlu0 %v1531_v10 }
 0x882   : > { %1588 = vrot.lane.b32.xlu0 %v3062_v45, %s2831_s0 }
 0x886   : > { %1647 = vrot.lane.b32.xlu0 %v3059_v42, %s2833_s22  ;;  %s3339_s22 = scalar_lea.vmem %s3304_s9, %s2960_s19 }
 0x8f5   : > { %v1530_v11 = vpop.xlane.xlu0 %1529 }
 0x8f6   : > { %2781 = vrcp.f32 %v1530_v11 }
 0x8f9   : > { %v1533_v12 = vpop.xlane.xlu0 %1532 }
 0x8fa   : > { %2783 = vrcp.f32 %v1533_v12 }
 0x8fd   : > { %v1589_v13 = vpop.permute.xlu0 %1588 }
 0x8fe   : > { %v1594_v14 = vsel %vm1083_vm4, %v1589_v13, 0 }
 0x8ff   : > { %2655 = vmatpush3.bf16.msra.mxu0 %v1594_v14  ;;  %v2753_v14 = vld [vmem:[%s2975_s21] sm:$0xff]  }
 0x900   : > { %v2782_v15 = vpop.eup %2781  ;;  %2666 = vmatprep.subr.bf16.mxu0 %v2821_v32 }
 0x901   : > { %v1536_v17 = vmul.f32 %v2782_v15, %v2778_v7  ;;  %v1648_v25 = vpop.permute.xlu0 %1647  ;;  %v2754_v15 = vld [vmem:[%s2975_s21 + $0x8] sm:$0xff]  }
 0x903   : > { %v1538_v18 = vpack.c.bf16 %v1536_v17, %v1536_v17 }
 0x904   : > { %v2784_v19 = vpop.eup %2783 }
 0x905   : > { %v1537_v21 = vmul.f32 %v2784_v19, %v2780_v9  ;;  %2651 = vmatmul.mubr.msk.bf16.vlgmr.msra.gmra.mrb[20].mxu1 %vm944_vm3, %v1538_v18 }
 0x906   : > { %2661 = vmatpush3.bf16.xpose.msra.mxu1 %v1655_v20  ;;  %2662 = vmatprep.mubr.msk.bf16.mxu1 %vm2822_vm1, %v2821_v32 }
 0x907   : > { %v1539_v23 = vpack.c.bf16 %v1537_v21, %v1537_v21  ;;  %2672 = vmatprep.subr.bf16.mxu1 %v2821_v32 }
 0x909   : > { %2657 = vmatmul.mubr.msk.bf16.vlgmr.msra.gmra.mrb[24].mxu0 %vm944_vm3, %v1539_v23 }
 0x90a   : > { %2667 = vmatpush3.bf16.xpose.msra.mxu0 %v1705_v24  ;;  %2668 = vmatprep.mubr.msk.bf16.mxu0 %vm2822_vm1, %v2821_v32 }
 0x90b   : > { %2678 = vmatprep.subr.bf16.mxu0 %v2821_v32 }
 0x90d   : > { %2663 = vmatmul.mubr.msk.bf16.vlgmr.msra.gmra.mrb[24].mxu1 %vm944_vm3, %v1648_v25 }
 0x90e   : > { %2674 = vmatprep.mubr.msk.bf16.mxu1 %vm2822_vm1, %v2821_v32 }
 0x911   : > { %2669 = vmatmul.mubr.msk.bf16.vlgmr.msra.gmra.mrb[28].mxu0 %vm944_vm3, %v1698_v26 }
 0x912   : > { %2680 = vmatprep.mubr.msk.bf16.mxu0 %vm2822_vm1, %v2821_v32 }
 0x9d8   : > { %v1582_v27 = vpop.f32.mrb[20].mxu1 }
 0x9d9   : > { %v2652_v28 = vpop.f32.mrb[21].mxu1 }
 0x9da   : > { %v1585_v29 = vpop.f32.mrb[22].mxu1 }
 0x9db   : > { %v2653_v30 = vpop.f32.mrb[23].mxu1  ;;  %v2499_v29 = vld [vmem:[%s3337_s28] ss:$0 sm:$0xff]  ;;  %s3340_s28 = sld [smem:[#allocation12_spill]] (!%p2517_p5) }
 0x9dc   : > { %v1630_v31 = vpop.f32.mrb[24].mxu0 }
 0x9dd   : > { %v2658_v33 = vpop.f32.mrb[25].mxu0 }
 0x9de   : > { %v1633_v36 = vpop.f32.mrb[26].mxu0 }
 0x9df   : > { %v2659_v38 = vpop.f32.mrb[27].mxu0 }
 0x9e0   : > { %v1691_v39 = vpop.f32.mrb[24].mxu1 }
 0x9e1   : > { %v1747_v40 = vmul.f32 0.35355338, %v1691_v39  ;;  %v2664_v43 = vpop.f32.mrb[25].mxu1 }
 0x9e2   : > { %v1694_v44 = vpop.f32.mrb[26].mxu1 }
 0x9e3   : > { %v2665_v46 = vpop.f32.mrb[27].mxu1  ;;  %v1749_v47 = vadd.f32 %v1747_v40, %v3080_v60 }
 0x9e4   : > { %v1741_v48 = vpop.f32.mrb[28].mxu0 }
 0x9e5   : > { %v1748_v49 = vmul.f32 0.35355338, %v1741_v48  ;;  %v2670_v50 = vpop.f32.mrb[29].mxu0  ;;  %v1751_v51 = vsel %vm944_vm3, %v1749_v47, -inf }
 0x9e6   : > { %1752 = vmax.xlane.f32.xlu0 %v1751_v51  ;;  %v1744_v52 = vpop.f32.mrb[30].mxu0 }
 0x9e7   : > { %v2671_v53 = vpop.f32.mrb[31].mxu0  ;;  %v1750_v54 = vadd.f32 %v1748_v49, %v3083_v4 }
 0x9e9   : > { %v1754_v55 = vsel %vm944_vm3, %v1750_v54, -inf }
 0x9ea   : > { %1755 = vmax.xlane.f32.xlu1 %v1754_v55 }
 0x9fb   : > { %1775 = vrot.lane.b32.xlu1 %v3059_v42, %s2834_s26 }
 0x9ff   : > { %1403 = vrot.lane.b32.xlu1 %v3150_v37, %s2835_s18 }
 0xa03   : > { %1405 = vrot.lane.b32.xlu1 %v3152_v41, %s2835_s18  ;;  %s3343_s18 = sld [smem:[#allocation15_spill]] (!%p2517_p5) }
 0xa07   : > { %1640 = vrot.lane.b32.xlu1 %v1630_v31, %s2836_s20 }
 0xa73   : > { %v1753_v60 = vpop.xlane.xlu0 %1752 }
 0xa74   : > { %v1757_v56 = vsub.f32 %v1749_v47, %v1753_v60  ;;  %v2756_v60 = vld [vmem:[%s2992_s4 + $0x8] sm:$0xff]  }
 0xa76   : > { %v1759_v57 = vmul.f32 1.442695, %v1757_v56 }
 0xa77   : > { %v1756_v58 = vpop.xlane.xlu1 %1755 }
 0xa78   : > { %2785 = vpow2.f32 %v1759_v57  ;;  %v1758_v4 = vsub.f32 %v1750_v54, %v1756_v58 }
 0xa7a   : > { %v1761_v59 = vmul.f32 1.442695, %v1758_v4 }
 0xa7b   : > { %v1776_v61 = vpop.permute.xlu1 %1775 }
 0xa7c   : > { %2787 = vpow2.f32 %v1761_v59  ;;  %v1781_v62 = vsel %vm1083_vm4, %v1776_v61, 0 }
 0xa7d   : > { %2673 = vmatpush3.bf16.msra.mxu1 %v1781_v62 }
 0xa7e   : > { %2684 = vmatprep.subr.bf16.mxu1 %v2821_v32 }
 0xa7f   : > { %v1404_v42 = vpop.permute.xlu1 %1403 }
 0xa80   : > { %1410 = vst.msk [vmem:[#allocation3] sm:$0xff] %vm1409_vm5, %v1404_v42 }
 0xa82   : > { %v2786_v37 = vpop.eup %2785 }
 0xa83   : > { %v1406_v41 = vpop.permute.xlu1 %1405  ;;  %v1763_v63 = vsel %vm944_vm3, %v2786_v37, 0.0 }
 0xa84   : > { %1411 = vst.msk [vmem:[#allocation3 + $0x8] sm:$0xff] %vm1409_vm5, %v1406_v41  ;;  %1764 = vadd.xlane.f32.xlu0 %v1763_v63 }
 0xa86   : > { %v2788_v0 = vpop.eup %2787 }
 0xa87   : > { %v1641_v1 = vpop.permute.xlu1 %1640  ;;  %v1766_v2 = vsel %vm944_vm3, %v2788_v0, 0.0 }
 0xa88   : > { %1646 = vst.msk [vmem:[#allocation3 + $0x8] sm:$0xff] %vm1644_vm6, %v1641_v1  ;;  %1767 = vadd.xlane.f32.xlu0 %v1766_v2  ;;  %v2504_v1 = vld [vmem:[%s3339_s22] ss:$0 sm:$0xff] }
 0xa9e   : > { %1823 = vrot.lane.b32.xlu0 %v3062_v45, %s2834_s26 }
 0xaa2   : > { %1638 = vrot.lane.b32.xlu0 %v1582_v27, %s2836_s20 }
 0xb11   : > { %v1765_v3 = vpop.xlane.xlu0 %1764 }
 0xb12   : > { %2789 = vrcp.f32 %v1765_v3 }
 0xb15   : > { %v1768_v5 = vpop.xlane.xlu0 %1767 }
 0xb16   : > { %2791 = vrcp.f32 %v1768_v5 }
 0xb19   : > { %v1824_v6 = vpop.permute.xlu0 %1823 }
 0xb1a   : > { %v1829_v7 = vsel %vm1083_vm4, %v1824_v6, 0 }
 0xb1b   : > { %2679 = vmatpush3.bf16.msra.mxu0 %v1829_v7  ;;  %v2757_v7 = vld [vmem:[%s3002_s23] sm:$0xff]  }
 0xb1c   : > { %v2790_v8 = vpop.eup %2789  ;;  %2692 = vmatprep.subr.bf16.mxu0 %v2821_v32 }
 0xb1d   : > { %v1771_v9 = vmul.f32 %v2790_v8, %v2786_v37  ;;  %v1639_v10 = vpop.permute.xlu0 %1638  ;;  %v2758_v8 = vld [vmem:[%s3002_s23 + $0x8] sm:$0xff]  }
 0xb1e   : > { %1645 = vst.msk [vmem:[#allocation3] sm:$0xff] %vm1644_vm6, %v1639_v10  ;;  %v2760_v10 = vld [vmem:[%s3002_s23 + $0x18] sm:$0xff]  }
 0xb1f   : > { %v1773_v11 = vpack.c.bf16 %v1771_v9, %v1771_v9  ;;  %v2759_v9 = vld [vmem:[%s3002_s23 + $0x10] sm:$0xff]  }
 0xb20   : > { %v2792_v45 = vpop.eup %2791 }
 0xb21   : > { %v1772_v12 = vmul.f32 %v2792_v45, %v2788_v0  ;;  %2675 = vmatmul.mubr.msk.bf16.vlgmr.msra.gmra.mrb[28].mxu1 %vm944_vm3, %v1773_v11  ;;  %v2505_v11 = vld [vmem:[%s774_s6] ss:$0 sm:$0xff] }
 0xb22   : > { %2688 = vmatprep.mubr.msk.bf16.mxu1 %vm2822_vm1, %v2821_v32  ;;  %2685 = vmatpush3.bf16.msra.mxu1 %v2753_v14 }
 0xb23   : > { %v1774_v13 = vpack.c.bf16 %v1772_v12, %v1772_v12  ;;  %2686 = vmatprep.subr.bf16.mxu1 %v2821_v32 }
 0xb25   : > { %2681 = vmatmul.mubr.msk.bf16.vlgmr.msra.gmra.mrb[32].mxu0 %vm944_vm3, %v1774_v13 }
 0xb26   : > { %2696 = vmatprep.mubr.msk.bf16.mxu0 %vm2822_vm1, %v2821_v32  ;;  %2687 = vmatpush3.bf16.msra.mxu1 %v2754_v15 }
 0xb27   : > { %2700 = vmatprep.subr.bf16.mxu1 %v2821_v32 }
 0xbf4   : > { %v1817_v16 = vpop.f32.mrb[28].mxu1 }
 0xbf5   : > { %1873 = vrot.lane.b32.xlu0 %v1817_v16, %s2837_s3  ;;  %v2676_v17 = vpop.f32.mrb[29].mxu1 }
 0xbf6   : > { %v1820_v18 = vpop.f32.mrb[30].mxu1 }
 0xbf7   : > { %v2677_v19 = vpop.f32.mrb[31].mxu1 }
 0xbf8   : > { %v1865_v20 = vpop.f32.mrb[32].mxu0 }
 0xbf9   : > { %1875 = vrot.lane.b32.xlu1 %v1865_v20, %s2837_s3  ;;  %v2682_v21 = vpop.f32.mrb[33].mxu0 }
 0xbfa   : > { %v1868_v22 = vpop.f32.mrb[34].mxu0 }
 0xbfb   : > { %v2683_v23 = vpop.f32.mrb[35].mxu0 }
 0xc67   : > { %v1874_v24 = vpop.permute.xlu0 %1873 }
 0xc68   : > { %1880 = vst.msk [vmem:[#allocation3] sm:$0xff] %vm1879_vm7, %v1874_v24 }
 0xc6b   : > { %v1876_v25 = vpop.permute.xlu1 %1875 }
 0xc6c   : > { %1881 = vst.msk [vmem:[#allocation3 + $0x8] sm:$0xff] %vm1879_vm7, %v1876_v25 }
 0xc6f   : > { %v1882_v26 = vld [vmem:[#allocation3] sm:$0xff] }
 0xc73   : > { %v1883_v27 = vld [vmem:[#allocation3 + $0x8] sm:$0xff] }
 0xc74   : > { %v1884_v28 = vpack.c.bf16 %v1883_v27, %v1882_v26 }
 0xc76   : > { %2689 = vmatmul.mubr.msk.bf16.vlgmr.msra.gmra.mrb[32].mxu1 %vm870_vm2, %v1884_v28 }
 0xc77   : > { %2708 = vmatprep.mubr.msk.bf16.mxu1 %vm2822_vm1, %v2821_v32  ;;  %2701 = vmatpush3.bf16.msra.mxu1 %v2757_v7 }
 0xc78   : > { %2702 = vmatprep.subr.bf16.mxu1 %v2821_v32 }
 0xc7b   : > { %2703 = vmatpush3.bf16.msra.mxu1 %v2758_v8 }
 0xc7c   : > { %2704 = vmatprep.subr.bf16.mxu1 %v2821_v32 }
 0xc7f   : > { %2705 = vmatpush3.bf16.msra.mxu1 %v2759_v9 }
 0xc80   : > { %2706 = vmatprep.subr.bf16.mxu1 %v2821_v32 }
 0xc83   : > { %2707 = vmatpush3.bf16.msra.mxu1 %v2760_v10  ;;  %v2805_v10 = vld [vmem:[%s3340_s28] sm:$0xff] (!%p2517_p5)  }
 0xd49   : > { %v1945_v30 = vpop.f32.mrb[32].mxu1 }
 0xd4a   : > { %v1946_v31 = vadd.f32 %v2499_v29, %v1945_v30  ;;  %v2690_v33 = vpop.f32.mrb[33].mxu1 }
 0xd4b   : > { %v1948_v36 = vpop.f32.mrb[34].mxu1 }
 0xd4c   : > { %v1949_v38 = vadd.f32 %v2499_v29, %v1948_v36  ;;  %v2691_v39 = vpop.f32.mrb[35].mxu1  ;;  %v1952_v40 = vadd.f32 %v1946_v31, %v3041_v34 }
 0xd4d   : > { %v2509_v39 = vld [vmem:[%s782_s25] ss:$0 sm:$0xff] }
 0xd4e   : > { %v1956_v43 = vsel %vm870_vm2, %v1952_v40, 0.0  ;;  %v1953_v44 = vadd.f32 %v1949_v38, %v3043_v35  ;;  %v2755_v35 = vld [vmem:[%s2992_s4] sm:$0xff]   ;;  %s3338_s4 = scalar_lea.vmem %s3303_s8, %s2960_s19 }
 0xd4f   : > { %1957 = vadd.xlane.f32.xlu0 %v1956_v43  ;;  %2693 = vmatpush3.bf16.msra.mxu0 %v2755_v35  ;;  %v2503_v37 = vld [vmem:[%s3338_s4] ss:$0 sm:$0xff] }
 0xd50   : > { %v1959_v46 = vsel %vm870_vm2, %v1953_v44, 0.0  ;;  %2694 = vmatprep.subr.bf16.mxu0 %v2821_v32 }
 0xd51   : > { %1960 = vadd.xlane.f32.xlu1 %v1959_v46 }
 0xd53   : > { %2695 = vmatpush3.bf16.msra.mxu0 %v2756_v60 }
 0xddc   : > { %v1958_v47 = vpop.xlane.xlu0 %1957 }
 0xddd   : > { %v1963_v48 = vmul.f32 0.03125, %v1958_v47 }
 0xdde   : > { %v1961_v49 = vpop.xlane.xlu1 %1960 }
 0xddf   : > { %v1965_v50 = vsub.f32 %v1952_v40, %v1963_v48  ;;  %v1964_v51 = vmul.f32 0.03125, %v1961_v49 }
 0xde1   : > { %v1966_v52 = vsub.f32 %v1953_v44, %v1964_v51  ;;  %v1967_v53 = vmul.f32 %v1965_v50, %v1965_v50 }
 0xde3   : > { %v1969_v54 = vsel %vm870_vm2, %v1967_v53, 0.0  ;;  %v1968_v34 = vmul.f32 %v1966_v52, %v1966_v52 }
 0xde4   : > { %1970 = vadd.xlane.f32.xlu0 %v1969_v54 }
 0xde5   : > { %v1972_v55 = vsel %vm870_vm2, %v1968_v34, 0.0 }
 0xde8   : > { %1973 = vadd.xlane.f32.xlu0 %v1972_v55 }
 0xe71   : > { %v1971_v56 = vpop.xlane.xlu0 %1970 }
 0xe72   : > { %v1975_v57 = vmul.f32 0.03125, %v1971_v56 }
 0xe74   : > { %v1977_v58 = vadd.f32 1e-12, %v1975_v57 }
 0xe75   : > { %v1974_v4 = vpop.xlane.xlu0 %1973 }
 0xe76   : > { %2793 = vrsqrt.f32 %v1977_v58  ;;  %v1976_v59 = vmul.f32 0.03125, %v1974_v4 }
 0xe78   : > { %v1978_v61 = vadd.f32 1e-12, %v1976_v59 }
 0xe7a   : > { %2795 = vrsqrt.f32 %v1978_v61 }
 0xe80   : > { %v2794_v62 = vpop.eup %2793 }
 0xe81   : > { %v1981_v42 = vmul.f32 %v2794_v62, %v1965_v50 }
 0xe83   : > { %v1989_v63 = vmul.f32 %v2503_v37, %v1981_v42 }
 0xe84   : > { %v2796_v41 = vpop.eup %2795 }
 0xe85   : > { %v1982_v0 = vmul.f32 %v2796_v41, %v1966_v52  ;;  %v1997_v3 = vadd.f32 %v2504_v1, %v1989_v63 }
 0xe87   : > { %v1990_v2 = vmul.f32 %v2503_v37, %v1982_v0  ;;  %v2515_v0 = vld [vmem:[%s785_s27] ss:$0 sm:$0xff] }
 0xe89   : > { %v1998_v5 = vadd.f32 %v2504_v1, %v1990_v2 }
 0xe8b   : > { %v1999_v6 = vpack.c.bf16 %v1998_v5, %v1997_v3 }
 0xe8d   : > { %2697 = vmatmul.mubr.msk.bf16.vlgmr.msra.gmra.mrb[36].mxu0 %vm870_vm2, %v1999_v6 }
 0xf60   : > { %v2060_v45 = vpop.f32.mrb[36].mxu0 }
 0xf61   : > { %v2061_v12 = vadd.f32 %v2505_v11, %v2060_v45  ;;  %v2698_v13 = vpop.f32.mrb[37].mxu0 }
 0xf62   : > { %v2063_v14 = vpop.f32.mrb[38].mxu0  ;;  %v2806_v13 = vld [vmem:[%s3340_s28 + $0x8] sm:$0xff] (!%p2517_p5)  }
 0xf63   : > { %v2067_v15 = vmul.f32 %v2061_v12, %v2061_v12  ;;  %v2064_v16 = vadd.f32 %v2505_v11, %v2063_v14  ;;  %v2699_v17 = vpop.f32.mrb[39].mxu0 }
 0xf65   : > { %v2069_v18 = vmul.f32 %v2067_v15, %v2061_v12  ;;  %v2068_v19 = vmul.f32 %v2064_v16, %v2064_v16 }
 0xf67   : > { %v2071_v20 = vmul.f32 0.044715, %v2069_v18  ;;  %v2070_v21 = vmul.f32 %v2068_v19, %v2064_v16  ;;  %v2518_v19 = vld [vmem:[%s3341_s30] ss:$0 sm:$0xff] (!%p2517_p5) }
 0xf69   : > { %v2073_v22 = vadd.f32 %v2071_v20, %v2061_v12  ;;  %v2072_v32 = vmul.f32 0.044715, %v2070_v21 }
 0xf6b   : > { %v2075_v23 = vmul.f32 0.7978846, %v2073_v22  ;;  %v2074_v24 = vadd.f32 %v2072_v32, %v2064_v16 }
 0xf6d   : > { %2797 = vtanh.f32 %v2075_v23  ;;  %v2076_v25 = vmul.f32 0.7978846, %v2074_v24  ;;  %v2522_v24 = vld [vmem:[%s3342_s16] ss:$0 sm:$0xff] (!%p2517_p5) }
 0xf6f   : > { %2799 = vtanh.f32 %v2076_v25 }
 0xf77   : > { %v2798_v26 = vpop.eup %2797 }
 0xf78   : > { %v2079_v27 = vadd.f32 1.0, %v2798_v26 }
 0xf79   : > { %v2800_v28 = vpop.eup %2799 }
 0xf7a   : > { %v2081_v29 = vmul.f32 0.5, %v2079_v27  ;;  %v2080_v30 = vadd.f32 1.0, %v2800_v28  ;;  %v2523_v28 = vld [vmem:[#allocation4] ss:$0 sm:$0xff] (!%p2517_p5) }
 0xf7c   : > { %v2082_v31 = vmul.f32 0.5, %v2080_v30  ;;  %v2083_v33 = vmul.f32 %v2081_v29, %v2061_v12  ;;  %v2838_v12 = vmov (!%p2517_p5), 0.0  }
 0xf7d   : > { %2712 = vmatprep.subr.bf16.mxu0 (!%p2517_p5), %v2838_v12  ;;  %2716 = vmatprep.mubr.msk.bf16.mxu0 (!%p2517_p5), %vm2839_vm9, %v2838_v12 }
 0xf7e   : > { %v2084_v36 = vmul.f32 %v2082_v31, %v2064_v16  ;;  %2713 = vmatpush3.bf16.msra.mxu0 (!%p2517_p5), %v2805_v10 }
 0xf7f   : > { %2714 = vmatprep.subr.bf16.mxu0 (!%p2517_p5), %v2838_v12 }
 0xf80   : > { %v2085_v38 = vpack.c.bf16 %v2084_v36, %v2083_v33 }
 0xf82   : > { %2709 = vmatmul.mubr.msk.bf16.vlgmr.msra.gmra.mrb[36].mxu1 %vm2125_vm8, %v2085_v38  ;;  %2715 = vmatpush3.bf16.msra.mxu0 (!%p2517_p5), %v2806_v13 }
0x1055   : > { %v2163_v40 = vpop.f32.mrb[36].mxu1 }
0x1056   : > { %v2164_v43 = vadd.f32 %v2509_v39, %v2163_v40  ;;  %v2710_v44 = vpop.f32.mrb[37].mxu1 }
0x1057   : > { %v2166_v46 = vpop.f32.mrb[38].mxu1 }
0x1058   : > { %v2167_v47 = vadd.f32 %v2509_v39, %v2166_v46  ;;  %v2711_v48 = vpop.f32.mrb[39].mxu1  ;;  %v2170_v49 = vadd.f32 %v2164_v43, %v1997_v3  ;;  %v2516_v3 = vld [vmem:[%s788_s17] ss:$0 sm:$0xff] }
0x105a   : > { %v2174_v50 = vsel %vm870_vm2, %v2170_v49, 0.0  ;;  %v2171_v51 = vadd.f32 %v2167_v47, %v1998_v5 }
0x105b   : > { %2175 = vadd.xlane.f32.xlu1 %v2174_v50 }
0x105c   : > { %v2177_v52 = vsel %vm870_vm2, %v2171_v51, 0.0 }
0x105d   : > { %2178 = vadd.xlane.f32.xlu0 %v2177_v52 }
0x10e8   : > { %v2176_v53 = vpop.xlane.xlu1 %2175 }
0x10e9   : > { %v2180_v54 = vmul.f32 0.03125, %v2176_v53 }
0x10ea   : > { %v2179_v34 = vpop.xlane.xlu0 %2178 }
0x10eb   : > { %v2182_v55 = vsub.f32 %v2170_v49, %v2180_v54  ;;  %v2181_v35 = vmul.f32 0.03125, %v2179_v34 }
0x10ed   : > { %v2183_v60 = vsub.f32 %v2171_v51, %v2181_v35  ;;  %v2184_v56 = vmul.f32 %v2182_v55, %v2182_v55 }
0x10ef   : > { %v2186_v57 = vsel %vm870_vm2, %v2184_v56, 0.0  ;;  %v2185_v58 = vmul.f32 %v2183_v60, %v2183_v60 }
0x10f0   : > { %2187 = vadd.xlane.f32.xlu1 %v2186_v57 }
0x10f1   : > { %v2189_v4 = vsel %vm870_vm2, %v2185_v58, 0.0 }
0x10f2   : > { %2190 = vadd.xlane.f32.xlu0 %v2189_v4 }
0x117d   : > { %v2188_v59 = vpop.xlane.xlu1 %2187 }
0x117e   : > { %v2192_v61 = vmul.f32 0.03125, %v2188_v59 }
0x117f   : > { %v2191_v62 = vpop.xlane.xlu0 %2190 }
0x1180   : > { %v2194_v42 = vadd.f32 1e-12, %v2192_v61  ;;  %v2193_v37 = vmul.f32 0.03125, %v2191_v62 }
0x1182   : > { %2801 = vrsqrt.f32 %v2194_v42  ;;  %v2195_v41 = vadd.f32 1e-12, %v2193_v37 }
0x1184   : > { %2803 = vrsqrt.f32 %v2195_v41 }
0x118c   : > { %v2802_v63 = vpop.eup %2801 }
0x118d   : > { %v2198_v1 = vmul.f32 %v2802_v63, %v2182_v55 }
0x118e   : > { %v2804_v2 = vpop.eup %2803 }
0x118f   : > { %v2206_v5 = vmul.f32 %v2515_v0, %v2198_v1  ;;  %v2199_v6 = vmul.f32 %v2804_v2, %v2183_v60  ;;  %2221 = sbr.rel (%p2517_p5) target bundleno = 4909 (0x132d), region = 108 }
0x1191   : > { %v2214_v7 = vadd.f32 %v2516_v3, %v2206_v5  ;;  %v2207_v8 = vmul.f32 %v2515_v0, %v2199_v6 }
0x1193   : > { %2216 = vst.msk [vmem:[#allocation2] sm:$0xff] %vm870_vm2, %v2214_v7  ;;  %v2215_v9 = vadd.f32 %v2516_v3, %v2207_v8  ;;  %v2222_v11 = vpack.c.bf16 (!%p2517_p5), %v2214_v7, %v2214_v7 }
0x1195   : > { %2217 = vst.msk [vmem:[#allocation2 + $0x8] sm:$0xff] %vm870_vm2, %v2215_v9  ;;  %v2223_v45 = vpack.c.bf16 (!%p2517_p5), %v2215_v9, %v2215_v9  ;;  %v2237_v14 = vunpack.c.l.b16 (!%p2517_p5), %v2222_v11 }
0x1197   : > { %v2238_v15 = vunpack.c.l.b16 %v2223_v45 }
0x1199   : > { %v2239_v16 = vrot.slane %v2238_v15, 7 }
0x119b   : > { %v2241_v17 = vsel %vm2240_vm10, %v2239_v16, %v2237_v14 }
0x119c   : > { %v2242_v18 = vpack.c.b16 %v2241_v17, %v2241_v17 }
0x119e   : > { %2717 = vmatmul.mubr.msk.bf16.vlgmr.msra.gmra.mrb[0].mxu0 %vm870_vm2, %v2242_v18 }
0x1271   : > { %v2292_v20 = vpop.f32.mrb[0].mxu0 }
0x1272   : > { %v2293_v21 = vadd.f32 %v2518_v19, %v2292_v20  ;;  %v2718_v22 = vpop.f32.mrb[1].mxu0 }
0x1273   : > { %v2295_v32 = vpop.f32.mrb[2].mxu0 }
0x1274   : > { %2807 = vtanh.f32 %v2293_v21  ;;  %v2719_v23 = vpop.f32.mrb[3].mxu0 }
0x127e   : > { %v2808_v25 = vpop.eup %2807 }
0x127f   : > { %v2306_v26 = vmul.f32 %v2808_v25, %v2522_v24 }
0x1281   : > { %v2308_v27 = vsel %vm2307_vm11, %v2306_v26, 0.0 }
0x1282   : > { %2309 = vadd.xlane.f32.xlu0 %v2308_v27 }
0x130f   : > { %v2310_v29 = vpop.xlane.xlu0 %2309 }
0x1310   : > { %v2318_v30 = vadd.f32 %v2523_v28, %v2310_v29 }
0x1312   : > { %v2524_v31 = vmul.f32 -1.442695, %v2318_v30 }
0x1314   : > { %2809 = vpow2.f32 %v2524_v31 }
0x131e   : > { %v2810_v33 = vpop.eup %2809 }
0x131f   : > { %v2322_v36 = vadd.f32 1.0, %v2810_v33 }
0x1321   : > { %2811 = vrcp.f32 %v2322_v36 }
0x132b   : > { %v2812_v38 = vpop.eup %2811 }
0x132c   : > { %2326 = vst.msk [vmem:[%s3343_s18] sm:$0x3] %vm2325_vm12, %v2812_v38 }
0x132d PF: > { %s3344_s6 = sld [smem:[#allocation5_spill]] }
0x1333   : > { %s32_s23 = sadd.s32 1, %s3344_s6  }
0x1334   : > { %p29_p6 = scmp.ge.s32.totalorder %s32_s23, 4  }
0x1336   :  { %31 = sbr.rel (!%p29_p6) target bundleno = 11 (0xb), region = 167 }

</bundles_post_ra>
